<compile_context>
chip_gen: v5e
topology: v5e:2x2
jax: 0.10.0
libtpu: 0.0.40
codegen_flags: <defaults>
</compile_context>

<pallas_src>
import functools

import jax
import jax.numpy as jnp
from jax.experimental import pallas as pl
from jax.experimental.pallas import tpu as pltpu


def costum_loss_kernel(logits_ref, tgt_ref, gamma_ref, reg_ref, loss_ref, *, n_rows):
    """Fused mean-reduced cross-entropy + gamma * regularization.

    logits_ref: (block_b, C) f32 VMEM tile of logits
    tgt_ref:    (block_b, 1) i32 VMEM tile of class indices
    gamma_ref:  (1, 1) f32 SMEM scalar (trainable parameter of the module)
    reg_ref:    (1, 1) f32 SMEM scalar (regularization value)
    loss_ref:   (1, 1) f32 output, VMEM-resident accumulator across the grid
    """
    i = pl.program_id(0)
    block_b, num_classes = logits_ref.shape

    @pl.when(i == 0)
    def _():
        loss_ref[...] = jnp.zeros_like(loss_ref)

    logits = logits_ref[...]
    targets = tgt_ref[...]

    # Mask rows of the (possibly padded) last tile.
    row_ids = i * block_b + jax.lax.broadcasted_iota(jnp.int32, (block_b, 1), 0)
    valid = row_ids < n_rows
    logits = jnp.where(valid, logits, 0.0)  # sanitize padded rows (avoid inf/nan)

    # Numerically stable row-wise log-sum-exp.
    m = jnp.max(logits, axis=-1, keepdims=True)
    lse = m + jnp.log(jnp.sum(jnp.exp(logits - m), axis=-1, keepdims=True))

    # Gather the logit at the target class with a one-hot mask (lane-parallel, C is small).
    class_ids = jax.lax.broadcasted_iota(jnp.int32, (block_b, num_classes), 1)
    onehot = (class_ids == targets).astype(jnp.float32)
    tgt_logit = jnp.sum(onehot * logits, axis=-1, keepdims=True)

    per_row = jnp.where(valid, lse - tgt_logit, 0.0)  # per-sample CE loss
    loss_ref[...] += jnp.sum(per_row, keepdims=True)

    @pl.when(i == pl.num_programs(0) - 1)
    def _():
        ce_mean = loss_ref[...] / jnp.float32(n_rows)
        loss_ref[...] = ce_mean + gamma_ref[0, 0] * reg_ref[0, 0]


@functools.partial(jax.jit, static_argnames=("block_b",))
def costum_loss(out, ce_target, regularization, gamma, block_b=256):
    """Pallas equivalent of CostumLoss.forward.

    out:            (B, C) float32 logits
    ce_target:      (B,)   integer class indices
    regularization: scalar float32
    gamma:          (1,)   float32 trainable parameter
    returns:        (1,)   float32 loss = mean CE + gamma * regularization
    """
    B, C = out.shape

    # Batch tile: large and sublane-aligned (multiple of 8); clamp so tiny batches
    # still produce a valid block, and let cdiv + in-kernel masking handle partials.
    block_b = max(8, min(int(block_b), ((B + 7) // 8) * 8))
    grid = (pl.cdiv(B, block_b),)

    targets2d = ce_target.astype(jnp.int32).reshape(B, 1)
    gamma2d = jnp.asarray(gamma, jnp.float32).reshape(1, 1)
    reg2d = jnp.asarray(regularization, jnp.float32).reshape(1, 1)

    kernel = functools.partial(costum_loss_kernel, n_rows=B)

    loss = pl.pallas_call(
        kernel,
        out_shape=jax.ShapeDtypeStruct((1, 1), jnp.float32),
        grid_spec=pl.GridSpec(
            grid=grid,
            in_specs=[
                pl.BlockSpec((block_b, C), lambda i: (i, 0)),       # logits tile
                pl.BlockSpec((block_b, 1), lambda i: (i, 0)),       # target tile
                pl.BlockSpec(memory_space=pltpu.MemorySpace.SMEM),  # gamma (scalar)
                pl.BlockSpec(memory_space=pltpu.MemorySpace.SMEM),  # regularization (scalar)
            ],
            out_specs=pl.BlockSpec((1, 1), lambda i: (0, 0)),       # scalar accumulator
        ),
        compiler_params=pltpu.CompilerParams(
            # The single grid axis reduces into one resident scalar -> "arbitrary".
            dimension_semantics=("arbitrary",),
        ),
    )(out.astype(jnp.float32), targets2d, gamma2d, reg2d)

    return loss.reshape(1)


def reference_loss(out, ce_target, regularization, gamma):
    """Pure-JAX reference matching torch.nn.CrossEntropyLoss (mean) + gamma * reg."""
    lse = jax.scipy.special.logsumexp(out, axis=-1)
    tgt = jnp.take_along_axis(out, ce_target[:, None].astype(jnp.int32), axis=-1)[:, 0]
    ce = jnp.mean(lse - tgt)
    return ce + gamma * regularization


if __name__ == "__main__":
    key = jax.random.PRNGKey(0)
    k_logits, k_tgt, k_reg = jax.random.split(key, 3)

    B, C = 512, 4  # small (batch, num_classes) logits; block_b=256 -> 2 grid steps
    logits = jax.random.normal(k_logits, (B, C), jnp.float32)
    targets = jax.random.randint(k_tgt, (B,), 0, C, dtype=jnp.int32)
    # Deterministic stand-in for the model's regularization term (e.g. an L2 penalty).
    regularization = jnp.sum(jax.random.normal(k_reg, (16,), jnp.float32) ** 2)
    gamma = jnp.array([1e-4], jnp.float32)  # matches nn.Parameter(torch.tensor([0.0001]))

    loss = costum_loss(logits, targets, regularization, gamma, block_b=256)
    loss = jax.block_until_ready(loss)

    ref = reference_loss(logits, targets, regularization, gamma)
    assert loss.shape == (1,), loss.shape
    assert jnp.allclose(loss, ref, atol=1e-5, rtol=1e-5), (loss, ref)

    print("KERNEL_OK")
</pallas_src>

<mosaic_0001>
module attributes {stable_mosaic.version = 11 : i64} {
  func.func @costum_loss_kernel(%arg0: i32, %arg1: memref<256x4xf32, #tpu.memory_space<vmem>>, %arg2: memref<256x1xi32, #tpu.memory_space<vmem>>, %arg3: memref<1x1xf32, #tpu.memory_space<smem>>, %arg4: memref<1x1xf32, #tpu.memory_space<smem>>, %arg5: memref<1x1xf32, #tpu.memory_space<vmem>>) attributes {dimension_semantics = [#tpu.dimension_semantics<arbitrary>], iteration_bounds = array<i64: 2>, scalar_prefetch = 0 : i64, scratch_operands = 0 : i64, tpu.core_type = #tpu.core_type<tc>, window_params = [{transform_indices = @transform_0, window_bounds = array<i64: 256, 4>}, {transform_indices = @transform_1, window_bounds = array<i64: 256, 1>}, {transform_indices = @transform_2, window_bounds = array<i64: 1, 1>}, {transform_indices = @transform_3, window_bounds = array<i64: 1, 1>}, {pipeline_mode = #tpu.pipeline_mode<synchronous>, transform_indices = @transform_4, window_bounds = array<i64: 1, 1>}]} {
    %c0_i32 = arith.constant 0 : i32
    %0 = arith.cmpi eq, %arg0, %c0_i32 : i32
    %1 = arith.extui %0 : i1 to i32
    %c0_i32_0 = arith.constant 0 : i32
    %2 = arith.cmpi ne, %1, %c0_i32_0 : i32
    scf.if %2 {
      %cst_14 = arith.constant 0.000000e+00 : f32
      %46 = vector.broadcast %cst_14 : f32 to vector<1x1xf32>
      %c0_15 = arith.constant 0 : index
      %c0_16 = arith.constant 0 : index
      %47 = vector.load %arg5[%c0_15, %c0_16] : memref<1x1xf32, #tpu.memory_space<vmem>>, vector<1x1xf32>
      tpu.vector_store %arg5[%c0_15, %c0_16], %46 {strides = array<i32>} : memref<1x1xf32, #tpu.memory_space<vmem>>, vector<1x1xf32>,
    } else {
    }
    %c0 = arith.constant 0 : index
    %c0_1 = arith.constant 0 : index
    %3 = vector.load %arg1[%c0, %c0_1] : memref<256x4xf32, #tpu.memory_space<vmem>>, vector<256x4xf32>
    %c0_2 = arith.constant 0 : index
    %c0_3 = arith.constant 0 : index
    %4 = vector.load %arg2[%c0_2, %c0_3] : memref<256x1xi32, #tpu.memory_space<vmem>>, vector<256x1xi32>
    %c256_i32 = arith.constant 256 : i32
    %5 = arith.muli %arg0, %c256_i32 : i32
    %6 = tpu.iota {dimensions = array<i32: 0>} : vector<256x1xi32>
    %7 = vector.broadcast %5 : i32 to vector<256x1xi32>
    %8 = arith.addi %7, %6 : vector<256x1xi32>
    %c512_i32 = arith.constant 512 : i32
    %9 = vector.broadcast %c512_i32 : i32 to vector<256x1xi32>
    %10 = arith.cmpi slt, %8, %9 : vector<256x1xi32>
    %cst = arith.constant 0.000000e+00 : f32
    %11 = vector.shape_cast %10 : vector<256x1xi1> to vector<256x1xi1>
    %12 = vector.broadcast %11 : vector<256x1xi1> to vector<256x4xi1>
    %13 = vector.broadcast %cst : f32 to vector<256x4xf32>
    %14 = arith.select %12, %3, %13 : vector<256x4xi1>, vector<256x4xf32>
    %cst_4 = arith.constant dense<0xFF800000> : vector<256xf32>
    %15 = vector.multi_reduction <maximumf>, %14, %cst_4 [1] : vector<256x4xf32> to vector<256xf32>
    %16 = vector.shape_cast %15 : vector<256xf32> to vector<256x1xf32>
    %17 = vector.broadcast %16 : vector<256x1xf32> to vector<256x4xf32>
    %18 = arith.subf %14, %17 : vector<256x4xf32>
    %19 = math.exp %18 : vector<256x4xf32>
    %cst_5 = arith.constant dense<0.000000e+00> : vector<256xf32>
    %20 = vector.multi_reduction <add>, %19, %cst_5 [1] : vector<256x4xf32> to vector<256xf32>
    %21 = vector.shape_cast %20 : vector<256xf32> to vector<256x1xf32>
    %22 = math.log %21 : vector<256x1xf32>
    %23 = arith.addf %16, %22 : vector<256x1xf32>
    %24 = tpu.iota {dimensions = array<i32: 1>} : vector<256x4xi32>
    %25 = vector.broadcast %4 : vector<256x1xi32> to vector<256x4xi32>
    %26 = arith.cmpi eq, %24, %25 : vector<256x4xi32>
    %27 = arith.extui %26 : vector<256x4xi1> to vector<256x4xi32>
    %28 = arith.sitofp %27 : vector<256x4xi32> to vector<256x4xf32>
    %29 = arith.mulf %28, %14 : vector<256x4xf32>
    %cst_6 = arith.constant dense<0.000000e+00> : vector<256xf32>
    %30 = vector.multi_reduction <add>, %29, %cst_6 [1] : vector<256x4xf32> to vector<256xf32>
    %31 = vector.shape_cast %30 : vector<256xf32> to vector<256x1xf32>
    %32 = arith.subf %23, %31 : vector<256x1xf32>
    %cst_7 = arith.constant 0.000000e+00 : f32
    %33 = vector.broadcast %cst_7 : f32 to vector<256x1xf32>
    %34 = arith.select %10, %32, %33 : vector<256x1xi1>, vector<256x1xf32>
    %c0_8 = arith.constant 0 : index
    %c0_9 = arith.constant 0 : index
    %35 = vector.load %arg5[%c0_8, %c0_9] : memref<1x1xf32, #tpu.memory_space<vmem>>, vector<1x1xf32>
    %36 = vector.shape_cast %34 : vector<256x1xf32> to vector<1x256x1xf32>
    %cst_10 = arith.constant dense<0.000000e+00> : vector<1xf32>
    %37 = vector.multi_reduction <add>, %36, %cst_10 [1, 2] : vector<1x256x1xf32> to vector<1xf32>
    %38 = vector.shape_cast %37 : vector<1xf32> to vector<1x1x1xf32>
    %39 = vector.extract %38[0, 0, 0] : f32 from vector<1x1x1xf32>
    %40 = vector.broadcast %39 : f32 to vector<1x1xf32>
    %41 = arith.addf %35, %40 : vector<1x1xf32>
    %c0_11 = arith.constant 0 : index
    %c0_12 = arith.constant 0 : index
    %42 = vector.load %arg5[%c0_11, %c0_12] : memref<1x1xf32, #tpu.memory_space<vmem>>, vector<1x1xf32>
    tpu.vector_store %arg5[%c0_11, %c0_12], %41 {strides = array<i32>} : memref<1x1xf32, #tpu.memory_space<vmem>>, vector<1x1xf32>,
    %c1_i32 = arith.constant 1 : i32
    %43 = arith.cmpi eq, %arg0, %c1_i32 : i32
    %44 = arith.extui %43 : i1 to i32
    %c0_i32_13 = arith.constant 0 : i32
    %45 = arith.cmpi ne, %44, %c0_i32_13 : i32
    scf.if %45 {
      %c0_14 = arith.constant 0 : index
      %c0_15 = arith.constant 0 : index
      %46 = vector.load %arg5[%c0_14, %c0_15] : memref<1x1xf32, #tpu.memory_space<vmem>>, vector<1x1xf32>
      %cst_16 = arith.constant 5.120000e+02 : f32
      %47 = vector.broadcast %cst_16 : f32 to vector<1x1xf32>
      %48 = arith.divf %46, %47 : vector<1x1xf32>
      %c0_17 = arith.constant 0 : index
      %c0_18 = arith.constant 0 : index
      %49 = memref.load %arg3[%c0_17, %c0_18] : memref<1x1xf32, #tpu.memory_space<smem>>
      %c0_19 = arith.constant 0 : index
      %c0_20 = arith.constant 0 : index
      %50 = memref.load %arg4[%c0_19, %c0_20] : memref<1x1xf32, #tpu.memory_space<smem>>
      %51 = arith.mulf %49, %50 : f32
      %52 = vector.broadcast %51 : f32 to vector<1x1xf32>
      %53 = arith.addf %48, %52 : vector<1x1xf32>
      %c0_21 = arith.constant 0 : index
      %c0_22 = arith.constant 0 : index
      %54 = vector.load %arg5[%c0_21, %c0_22] : memref<1x1xf32, #tpu.memory_space<vmem>>, vector<1x1xf32>
      tpu.vector_store %arg5[%c0_21, %c0_22], %53 {strides = array<i32>} : memref<1x1xf32, #tpu.memory_space<vmem>>, vector<1x1xf32>,
    } else {
    }
    return
  }
  func.func @transform_0(%arg0: i32) -> (i32, i32) {
    %c0_i32 = arith.constant 0 : i32
    %c0_i32_0 = arith.constant 0 : i32
    return %arg0, %c0_i32 : i32, i32
  }
  func.func @transform_1(%arg0: i32) -> (i32, i32) {
    %c0_i32 = arith.constant 0 : i32
    %c0_i32_0 = arith.constant 0 : i32
    return %arg0, %c0_i32 : i32, i32
  }
  func.func @transform_2(%arg0: i32) -> (i32, i32) {
    %c0_i32 = arith.constant 0 : i32
    %c0_i32_0 = arith.constant 0 : i32
    %c0_i32_1 = arith.constant 0 : i32
    return %c0_i32, %c0_i32_0 : i32, i32
  }
  func.func @transform_3(%arg0: i32) -> (i32, i32) {
    %c0_i32 = arith.constant 0 : i32
    %c0_i32_0 = arith.constant 0 : i32
    %c0_i32_1 = arith.constant 0 : i32
    return %c0_i32, %c0_i32_0 : i32, i32
  }
  func.func @transform_4(%arg0: i32) -> (i32, i32) {
    %c0_i32 = arith.constant 0 : i32
    %c0_i32_0 = arith.constant 0 : i32
    %c0_i32_1 = arith.constant 0 : i32
    return %c0_i32, %c0_i32_0 : i32, i32
  }
}

</mosaic_0001>

<bundles_post_ra>
// kernel: costum_loss.1
= control target key start
LH: loop header
LB: loop body
LE: loop exit
PB: predicated region body
PF: predicated region fallthrough
CT: control target
= control target key end

     0   :  { %s2673_s0 = inlined_call_operand.vmem [shape: f32[512,4], index: 0, kind: input, shape index: {}]   ;;  %s2674_s1 = inlined_call_operand.vmem [shape: s32[512,1], index: 1, kind: input, shape index: {}]   ;;  %s2675_s2 = inlined_call_operand.<no memory space> [shape: f32[1,1], index: 2, kind: input, shape index: {}]   ;;  %s2676_s3 = inlined_call_operand.<no memory space> [shape: f32[1,1], index: 3, kind: input, shape index: {}]   ;;  %s2677_s4 = inlined_call_operand.hbm [shape: f32[1,1], index: 4, kind: output, shape index: {}]  }
   0x1   :  { %9 = sst [smem:[#allocation2]] %s2675_s2 }
   0x2   :  { %10 = sst [smem:[#allocation3]] %s2676_s3 }
   0x3   :  { %11 = vsyncpa [#allocation5], 0  ;;  %s1680_s19 = smov 0  }
   0x4 LB: > { %s1686_s20 = sadd.s32 4294967295, %s1642_s19   ;;  %p1406_p0 = scmp.ge.s32.totalorder %s1642_s19, 1  ;;  %s1642_s19 = sphi %s1680_s19, %s17_s19  }
   0x5   : > { %p172_p1 = scmp.lt.s32.totalorder %s1642_s19, 3 }
   0x7   : > { %p173_p2 = pnand %p1406_p0, %p172_p1 }
   0x9   : > { %176 = sbr.rel (%p173_p2) target bundleno = 1084 (0x43c), region = 36 }
   0xe   : > { %s1407_s2 = sshll.u32 %s1686_s20, 5  ;;  %p1411_p4 = scmp.ne.s32.totalorder %s1686_s20, 0 }
   0xf   : > { %p199_p3 = scmp.lt.s32.totalorder %s1407_s2, 63 }
  0x10   : > { %213 = sbr.rel (%p1411_p4) target bundleno = 23 (0x17), region = 40 }
  0x11   : > { %s2926_s2 = smov (!%p199_p3, %s1407_s2), 63 }
  0x12   : > { %s1408_s3 = sshll.u32 %s2926_s2, 3 }
  0x13   : > { %s1694_s23 = scalar_lea.vmem %s2673_s0, %s1408_s3  ;;  %s1699_s26 = scalar_lea.vmem %s2674_s1, %s1408_s3 }
  0x15   : > { %vm214_vm0 = vcmask 0   ;;  %v1644_v0 = vmov 0.0  }
  0x16   : > { %215 = vst.msk [vmem:[#allocation4] sm:$0x1] %vm214_vm0, %v1644_v0 }
  0x17 PF: > { %s1412_s27 = sshll.u32 %s1686_s20, 8  ;;  %v2687_v1 = vlaneseq  ;;  %v216_v4 = vld [vmem:[%s1694_s23] sm:$0xff]  ;;  %vm475_vm1 = vcmask 31744   ;;  %v218_v13 = vld [vmem:[%s1694_s23 + $0x10] sm:$0xff]  ;;  %v217_v21 = vld [vmem:[%s1694_s23 + $0x8] sm:$0xff]  ;;  %p1445_p5 = scmp.ne.s32.totalorder %s1686_s20, 1 }
  0x18   : > { %v1703_v2 = vstv %s1412_s27  ;;  %v220_v11 = vld [vmem:[%s1694_s23 + $0x20] sm:$0xff]  ;;  %v221_v26 = vld [vmem:[%s1694_s23 + $0x28] sm:$0xff]  ;;  %v219_v27 = vld [vmem:[%s1694_s23 + $0x18] sm:$0xff]  ;;  %s1337_s29 = sld [smem:[#allocation2]] (!%p1445_p5) }
  0x19   : > { %v1706_v3 = vshrl.u32 %v2687_v1, 7  ;;  %v222_v39 = vld [vmem:[%s1694_s23 + $0x30] sm:$0xff]  ;;  %v224_v41 = vld [vmem:[%s1694_s23 + $0x40] sm:$0xff]  ;;  %v223_v42 = vld [vmem:[%s1694_s23 + $0x38] sm:$0xff]  ;;  %s1338_s30 = sld [smem:[#allocation3]] (!%p1445_p5) }
  0x1a   : > { %v225_v54 = vld [vmem:[%s1694_s23 + $0x48] sm:$0xff]  ;;  %v227_v56 = vld [vmem:[%s1694_s23 + $0x58] sm:$0xff]  ;;  %v226_v57 = vld [vmem:[%s1694_s23 + $0x50] sm:$0xff] }
  0x1b   : > { %v1711_v5 = vadd.s32 %v1703_v2, %v1706_v3  ;;  %v286_v6 = vadd.s32 32, %v1706_v3  ;;  %v284_v7 = vadd.s32 16, %v1706_v3  ;;  %v283_v8 = vadd.s32 8, %v1706_v3 }
  0x1c   : > { %v287_v9 = vadd.s32 40, %v1706_v3  ;;  %v285_v10 = vadd.s32 24, %v1706_v3  ;;  %v288_v19 = vadd.s32 48, %v1706_v3  ;;  %v290_v28 = vadd.s32 64, %v1706_v3 }
  0x1d   : > { %vm347_vm2 = vcmp.lt.s32.totalorder %v1711_v5, 512  ;;  %v1721_v12 = vadd.s32 %v1703_v2, %v286_v6  ;;  %v1725_v14 = vadd.s32 %v1703_v2, %v284_v7  ;;  %v1728_v15 = vadd.s32 %v1703_v2, %v283_v8 }
  0x1e   : > { %v1732_v16 = vsel %vm347_vm2, %v216_v4, 0.0  ;;  %v1735_v17 = vadd.s32 %v1703_v2, %v287_v9  ;;  %v1738_v18 = vadd.s32 %v1703_v2, %v285_v10  ;;  %v1769_v30 = vadd.s32 %v1703_v2, %v288_v19  ;;  %v228_v9 = vld [vmem:[%s1694_s23 + $0x60] sm:$0xff] }
  0x1f   : > { %v476_v20 = vsel %vm475_vm1, %v1732_v16, -inf  ;;  %vm351_vm3 = vcmp.lt.s32.totalorder %v1721_v12, 512  ;;  %vm349_vm4 = vcmp.lt.s32.totalorder %v1725_v14, 512  ;;  %vm348_vm5 = vcmp.lt.s32.totalorder %v1728_v15, 512  ;;  %s1339_s5 = smul.f32 (!%p1445_p5), %s1338_s30, %s1337_s29 }
  0x20   : > { %477 = vmax.xlane.f32.xlu0 %v476_v20  ;;  %v1749_v22 = vsel %vm351_vm3, %v220_v11, 0.0  ;;  %v1753_v23 = vsel %vm349_vm4, %v218_v13, 0.0  ;;  %vm352_vm6 = vcmp.lt.s32.totalorder %v1735_v17, 512  ;;  %v1765_v29 = vsel %vm348_vm5, %v217_v21, 0.0  ;;  %v230_v11 = vld [vmem:[%s1694_s23 + $0x70] sm:$0xff]  ;;  %v229_v13 = vld [vmem:[%s1694_s23 + $0x68] sm:$0xff] }
  0x21   : > { %v488_v24 = vsel %vm475_vm1, %v1749_v22, -inf  ;;  %v482_v25 = vsel %vm475_vm1, %v1753_v23, -inf  ;;  %vm350_vm7 = vcmp.lt.s32.totalorder %v1738_v18, 512  ;;  %v289_v31 = vadd.s32 56, %v1706_v3 }
  0x22   : > { %489 = vmax.xlane.f32.xlu2 %v488_v24  ;;  %483 = vmax.xlane.f32.xlu1 %v482_v25  ;;  %v1774_v32 = vsel %vm352_vm6, %v221_v26, 0.0  ;;  %v1778_v33 = vsel %vm350_vm7, %v219_v27, 0.0  ;;  %v479_v34 = vsel %vm475_vm1, %v1765_v29, -inf  ;;  %v1783_v35 = vadd.s32 %v1703_v2, %v290_v28 }
  0x23   : > { %v1786_v36 = vadd.s32 %v1703_v2, %v289_v31  ;;  %v491_v37 = vsel %vm475_vm1, %v1774_v32, -inf  ;;  %v485_v38 = vsel %vm475_vm1, %v1778_v33, -inf  ;;  %vm353_vm8 = vcmp.lt.s32.totalorder %v1769_v30, 512 }
  0x24   : > { %v291_v40 = vadd.s32 72, %v1706_v3  ;;  %vm355_vm9 = vcmp.lt.s32.totalorder %v1783_v35, 512  ;;  %v293_v43 = vadd.s32 88, %v1706_v3  ;;  %v292_v44 = vadd.s32 80, %v1706_v3 }
  0x25   : > { %vm354_vm10 = vcmp.lt.s32.totalorder %v1786_v36, 512  ;;  %v1803_v45 = vsel %vm353_vm8, %v222_v39, 0.0  ;;  %v1810_v47 = vsel %vm355_vm9, %v224_v41, 0.0  ;;  %v294_v55 = vadd.s32 96, %v1706_v3 }
  0x26   : > { %v1806_v46 = vadd.s32 %v1703_v2, %v291_v40  ;;  %v1814_v48 = vsel %vm354_vm10, %v223_v42, 0.0  ;;  %v494_v49 = vsel %vm475_vm1, %v1803_v45, -inf  ;;  %v1819_v50 = vadd.s32 %v1703_v2, %v293_v43  ;;  %v231_v40 = vld [vmem:[%s1694_s23 + $0x78] sm:$0xff]  ;;  %v233_v43 = vld [vmem:[%s1694_s23 + $0x88] sm:$0xff] }
  0x27   : > { %v1822_v51 = vadd.s32 %v1703_v2, %v292_v44  ;;  %v500_v52 = vsel %vm475_vm1, %v1810_v47, -inf  ;;  %v497_v53 = vsel %vm475_vm1, %v1814_v48, -inf  ;;  %v296_v58 = vadd.s32 112, %v1706_v3  ;;  %v232_v44 = vld [vmem:[%s1694_s23 + $0x80] sm:$0xff] }
  0x28   : > { %480 = vmax.xlane.f32.xlu0 %v479_v34  ;;  %2753 = vst [vmem:[#allocation7_spill] sm:$0xff] %v1806_v46  ;;  %vm356_vm11 = vcmp.lt.s32.totalorder %v1806_v46, 512  ;;  %vm2752_vm12 = vcmp.lt.s32.totalorder %v1819_v50, 512  ;;  %v295_v59 = vadd.s32 104, %v1706_v3  ;;  %v1842_v61 = vadd.s32 %v1703_v2, %v294_v55 }
  0x29   : > { %2754 = vst [vmem:[#allocation8_spill] sm:$0xff] %v1819_v50  ;;  %vm357_vm13 = vcmp.lt.s32.totalorder %v1822_v51, 512  ;;  %v1839_v60 = vsel %vm356_vm11, %v225_v54, 0.0  ;;  %v1846_v62 = vsel %vm2752_vm12, %v227_v56, 0.0  ;;  %v1855_v4 = vadd.s32 %v1703_v2, %v296_v58 }
  0x2a   : > { %492 = vmax.xlane.f32.xlu2 %v491_v37  ;;  %486 = vmax.xlane.f32.xlu1 %v485_v38  ;;  %2755 = vst [vmem:[#allocation9_spill] sm:$0xff] %v1822_v51  ;;  %v1850_v63 = vsel %vm357_vm13, %v226_v57, 0.0  ;;  %v503_v0 = vsel %vm475_vm1, %v1839_v60, -inf  ;;  %v1858_v6 = vadd.s32 %v1703_v2, %v295_v59  ;;  %v509_v7 = vsel %vm475_vm1, %v1846_v62, -inf }
  0x2b   : > { %2756 = vst [vmem:[#allocation10_spill] sm:$0xff] %v1839_v60  ;;  %v506_v8 = vsel %vm475_vm1, %v1850_v63, -inf  ;;  %vm2679_vm14 = vcmp.lt.s32.totalorder %v1842_v61, 512  ;;  %v297_v10 = vadd.s32 120, %v1706_v3  ;;  %vm2678_vm15 = vcmp.lt.s32.totalorder %v1855_v4, 512 }
  0x2c   : > { %2757 = vst [vmem:[#allocation11_spill] sm:$0xff] %v1842_v61  ;;  %vm2680_vm0 = vcmp.lt.s32.totalorder %v1858_v6, 512  ;;  %v299_v19 = vadd.s32 136, %v1706_v3  ;;  %v298_v20 = vadd.s32 128, %v1706_v3  ;;  %v1875_v21 = vsel %vm2679_vm14, %v228_v9, 0.0 }
  0x2d   : > { %2758 = vst [vmem:[#allocation12_spill] sm:$0xff] %v1855_v4  ;;  %v308_v24 = vadd.s32 208, %v1706_v3  ;;  %v1879_v25 = vadd.s32 %v1703_v2, %v297_v10  ;;  %v1883_v26 = vsel %vm2678_vm15, %v230_v11, 0.0  ;;  %v1887_v27 = vsel %vm2680_vm0, %v229_v13, 0.0 }
  0x2e   : > { %2759 = vst [vmem:[#allocation13_spill] sm:$0xff] %v1858_v6  ;;  %v512_v31 = vsel %vm475_vm1, %v1875_v21, -inf  ;;  %v1895_v34 = vadd.s32 %v1703_v2, %v299_v19  ;;  %v1898_v37 = vadd.s32 %v1703_v2, %v298_v20  ;;  %v518_v38 = vsel %vm475_vm1, %v1883_v26, -inf  ;;  %v234_v19 = vld [vmem:[%s1694_s23 + $0x90] sm:$0xff] }
  0x2f   : > { %2760 = vst [vmem:[#allocation14_spill] sm:$0xff] %v1879_v25  ;;  %v1890_v28 = vadd.s32 %v1703_v2, %v308_v24  ;;  %v515_v39 = vsel %vm475_vm1, %v1887_v27, -inf  ;;  %vm2682_vm15 = vcmp.lt.s32.totalorder %v1879_v25, 512  ;;  %v300_v41 = vadd.s32 144, %v1706_v3  ;;  %v236_v24 = vld [vmem:[%s1694_s23 + $0xa0] sm:$0xff] }
  0x30   : > { %495 = vmax.xlane.f32.xlu0 %v494_v49  ;;  %2762 = vst [vmem:[#allocation16_spill] sm:$0xff] %v1895_v34  ;;  %v302_v42 = vadd.s32 160, %v1706_v3  ;;  %vm2681_vm14 = vcmp.lt.s32.totalorder %v1895_v34, 512  ;;  %vm2683_vm0 = vcmp.lt.s32.totalorder %v1898_v37, 512  ;;  %v301_v49 = vadd.s32 152, %v1706_v3 }
  0x31   : > { %2761 = vst [vmem:[#allocation15_spill] sm:$0xff] %v1890_v28  ;;  %v311_v54 = vadd.s32 232, %v1706_v3  ;;  %v1920_v55 = vadd.s32 %v1703_v2, %v300_v41  ;;  %v309_v57 = vadd.s32 216, %v1706_v3  ;;  %v1928_v58 = vsel %vm2681_vm14, %v233_v43, 0.0 }
  0x32   : > { %501 = vmax.xlane.f32.xlu2 %v500_v52  ;;  %498 = vmax.xlane.f32.xlu1 %v497_v53  ;;  %2763 = vst [vmem:[#allocation17_spill] sm:$0xff] %v1898_v37  ;;  %v307_v52 = vadd.s32 200, %v1706_v3  ;;  %v1916_v53 = vsel %vm2682_vm15, %v231_v40, 0.0  ;;  %v1932_v59 = vsel %vm2683_vm0, %v232_v44, 0.0  ;;  %v1943_v9 = vadd.s32 %v1703_v2, %v301_v49 }
  0x33   : > { %2764 = vst [vmem:[#allocation18_spill] sm:$0xff] %v1920_v55  ;;  %v1946_v10 = vadd.s32 %v1703_v2, %v309_v57  ;;  %v527_v11 = vsel %vm475_vm1, %v1928_v58, -inf  ;;  %v524_v13 = vsel %vm475_vm1, %v1932_v59, -inf  ;;  %vm2686_vm14 = vcmp.lt.s32.totalorder %v1920_v55, 512 }
  0x34   : > { %v1923_v56 = vadd.s32 %v1703_v2, %v307_v52  ;;  %2768 = vst [vmem:[#allocation22_spill] sm:$0xff] %v1943_v9  ;;  %v303_v20 = vadd.s32 168, %v1706_v3  ;;  %vm2685_vm0 = vcmp.lt.s32.totalorder %v1943_v9, 512  ;;  %v310_v40 = vadd.s32 224, %v1706_v3 }
  0x35   : > { %2769 = vst [vmem:[#allocation23_spill] sm:$0xff] %v1946_v10  ;;  %v1964_v41 = vsel %vm2686_vm14, %v234_v19, 0.0 }
  0x36   : > { %2765 = vst [vmem:[#allocation19_spill] sm:$0xff] %v1923_v56  ;;  %v1968_v43 = vadd.s32 %v1703_v2, %v303_v20  ;;  %v1971_v44 = vadd.s32 %v1703_v2, %v310_v40  ;;  %v530_v57 = vsel %vm475_vm1, %v1964_v41, -inf  ;;  %v237_v20 = vld [vmem:[%s1694_s23 + $0xa8] sm:$0xff] }
  0x38   : > { %504 = vmax.xlane.f32.xlu0 %v503_v0  ;;  %v1935_v0 = vadd.s32 %v1703_v2, %v302_v42  ;;  %v312_v42 = vadd.s32 240, %v1706_v3  ;;  %2770 = vst [vmem:[#allocation24_spill] sm:$0xff] %v1968_v43 }
  0x39   : > { %2771 = vst [vmem:[#allocation25_spill] sm:$0xff] %v1971_v44 }
  0x3a   : > { %510 = vmax.xlane.f32.xlu2 %v509_v7  ;;  %507 = vmax.xlane.f32.xlu1 %v506_v8  ;;  %2766 = vst [vmem:[#allocation20_spill] sm:$0xff] %v1935_v0  ;;  %v1938_v7 = vadd.s32 %v1703_v2, %v311_v54  ;;  %v521_v8 = vsel %vm475_vm1, %v1916_v53, -inf  ;;  %vm2684_vm15 = vcmp.lt.s32.totalorder %v1935_v0, 512  ;;  %v1982_v54 = vadd.s32 %v1703_v2, %v312_v42 }
  0x3b   : > { %v1975_v49 = vsel %vm2684_vm15, %v236_v24, 0.0  ;;  %vm2688_vm15 = vcmp.lt.s32.totalorder %v1968_v43, 512  ;;  %v306_v24 = vadd.s32 192, %v1706_v3 }
  0x3c   : > { %2767 = vst [vmem:[#allocation21_spill] sm:$0xff] %v1938_v7  ;;  %v2006_v40 = vsel %vm2688_vm15, %v237_v20, 0.0 }
  0x3d   : > { %2772 = vst [vmem:[#allocation26_spill] sm:$0xff] %v1982_v54 }
  0x40   : > { %513 = vmax.xlane.f32.xlu0 %v512_v31  ;;  %v235_v31 = vld [vmem:[%s1694_s23 + $0x98] sm:$0xff] }
  0x41   : > { %v1979_v52 = vsel %vm2685_vm0, %v235_v31, 0.0  ;;  %v313_v31 = vadd.s32 248, %v1706_v3 }
  0x42   : > { %519 = vmax.xlane.f32.xlu2 %v518_v38  ;;  %516 = vmax.xlane.f32.xlu1 %v515_v39  ;;  %v305_v38 = vadd.s32 184, %v1706_v3  ;;  %v304_v39 = vadd.s32 176, %v1706_v3  ;;  %v533_v19 = vsel %vm475_vm1, %v1979_v52, -inf }
  0x43   : > { %v2009_v42 = vadd.s32 %v1703_v2, %v313_v31  ;;  %v241_v31 = vld [vmem:[%s1694_s23 + $0xc8] sm:$0xff] }
  0x45   : > { %2775 = vst [vmem:[#allocation29_spill] sm:$0xff] %v2009_v42 }
  0x48   : > { %522 = vmax.xlane.f32.xlu0 %v521_v8  ;;  %v1987_v8 = vadd.s32 %v1703_v2, %v305_v38  ;;  %v239_v38 = vld [vmem:[%s1694_s23 + $0xb8] sm:$0xff] }
  0x4a   : > { %528 = vmax.xlane.f32.xlu2 %v527_v11  ;;  %525 = vmax.xlane.f32.xlu1 %v524_v13  ;;  %2773 = vst [vmem:[#allocation27_spill] sm:$0xff] %v1987_v8  ;;  %v1990_v11 = vadd.s32 %v1703_v2, %v304_v39  ;;  %v536_v13 = vsel %vm475_vm1, %v1975_v49, -inf  ;;  %vm2689_vm0 = vcmp.lt.s32.totalorder %v1987_v8, 512  ;;  %v238_v39 = vld [vmem:[%s1694_s23 + $0xb0] sm:$0xff] }
  0x4b   : > { %v2016_v3 = vsel %vm2689_vm0, %v239_v38, 0.0  ;;  %vm2694_vm0 = vcmp.lt.s32.totalorder %v1890_v28, 512 }
  0x4c   : > { %2774 = vst [vmem:[#allocation28_spill] sm:$0xff] %v1990_v11  ;;  %vm2690_vm14 = vcmp.lt.s32.totalorder %v1990_v11, 512 }
  0x4d   : > { %v2020_v1 = vsel %vm2690_vm14, %v238_v39, 0.0  ;;  %vm2695_vm14 = vcmp.lt.s32.totalorder %v1923_v56, 512 }
  0x4e   : > { %v542_v20 = vsel %vm475_vm1, %v2020_v1, -inf }
  0x50   : > { %531 = vmax.xlane.f32.xlu0 %v530_v57  ;;  %v2012_v57 = vadd.s32 %v1703_v2, %v306_v24  ;;  %v240_v2 = vld [vmem:[%s1694_s23 + $0xc0] sm:$0xff]  ;;  %v242_v24 = vld [vmem:[%s1694_s23 + $0xd0] sm:$0xff] }
  0x51   : > { %v2040_v39 = vsel %vm2694_vm0, %v242_v24, 0.0  ;;  %vm2700_vm0 = vcmp.lt.s32.totalorder %v1938_v7, 512  ;;  %v244_v24 = vld [vmem:[%s1694_s23 + $0xe0] sm:$0xff] }
  0x52   : > { %537 = vmax.xlane.f32.xlu2 %v536_v13  ;;  %534 = vmax.xlane.f32.xlu1 %v533_v19  ;;  %2776 = vst [vmem:[#allocation30_spill] sm:$0xff] %v2012_v57  ;;  %v539_v13 = vsel %vm475_vm1, %v2006_v40, -inf  ;;  %v545_v19 = vsel %vm475_vm1, %v2016_v3, -inf  ;;  %vm2693_vm15 = vcmp.lt.s32.totalorder %v2012_v57, 512  ;;  %v554_v11 = vsel %vm475_vm1, %v2040_v39, -inf }
  0x53   : > { %v2036_v38 = vsel %vm2693_vm15, %v240_v2, 0.0  ;;  %2777 = vst [vmem:[#allocation31_spill] sm:$0xff] %v2040_v39  ;;  %vm2699_vm15 = vcmp.lt.s32.totalorder %v1946_v10, 512  ;;  %v245_v2 = vld [vmem:[%s1694_s23 + $0xe8] sm:$0xff] }
  0x54   : > { %v548_v8 = vsel %vm475_vm1, %v2036_v38, -inf  ;;  %v2064_v28 = vsel %vm2700_vm0, %v245_v2, 0.0  ;;  %vm2748_vm0 = vcmp.lt.s32.totalorder %v2009_v42, 512 }
  0x55   : > { %2779 = vst [vmem:[#allocation33_spill] sm:$0xff] %v2064_v28  ;;  %v563_v57 = vsel %vm475_vm1, %v2064_v28, -inf }
  0x58   : > { %540 = vmax.xlane.f32.xlu0 %v539_v13  ;;  %v2044_v13 = vsel %vm2695_vm14, %v241_v31, 0.0  ;;  %vm2751_vm14 = vcmp.lt.s32.totalorder %v1971_v44, 512 }
  0x5a   : > { %546 = vmax.xlane.f32.xlu2 %v545_v19  ;;  %543 = vmax.xlane.f32.xlu1 %v542_v20  ;;  %v551_v19 = vsel %vm475_vm1, %v2044_v13, -inf  ;;  %v243_v20 = vld [vmem:[%s1694_s23 + $0xd8] sm:$0xff] }
  0x5b   : > { %v2060_v31 = vsel %vm2699_vm15, %v243_v20, 0.0  ;;  %vm2750_vm15 = vcmp.lt.s32.totalorder %v1982_v54, 512  ;;  %v247_v20 = vld [vmem:[%s1694_s23 + $0xf8] sm:$0xff] }
  0x5c   : > { %2778 = vst [vmem:[#allocation32_spill] sm:$0xff] %v2060_v31  ;;  %v557_v56 = vsel %vm475_vm1, %v2060_v31, -inf }
  0x60   : > { %549 = vmax.xlane.f32.xlu0 %v548_v8  ;;  %v2068_v8 = vsel %vm2751_vm14, %v244_v24, 0.0  ;;  %v2086_v24 = vsel %vm2748_vm0, %v247_v20, 0.0 }
  0x61   : > { %2780 = vst [vmem:[#allocation34_spill] sm:$0xff] %v2068_v8  ;;  %v569_v7 = vsel %vm475_vm1, %v2086_v24, -inf }
  0x62   : > { %555 = vmax.xlane.f32.xlu2 %v554_v11  ;;  %552 = vmax.xlane.f32.xlu1 %v551_v19  ;;  %v560_v11 = vsel %vm475_vm1, %v2068_v8, -inf  ;;  %v246_v19 = vld [vmem:[%s1694_s23 + $0xf0] sm:$0xff]  ;;  %2782 = vst [vmem:[#allocation36_spill] sm:$0xff] %v2086_v24 }
  0x63   : > { %v2082_v2 = vsel %vm2750_vm15, %v246_v19, 0.0 }
  0x64   : > { %2781 = vst [vmem:[#allocation35_spill] sm:$0xff] %v2082_v2  ;;  %v566_v44 = vsel %vm475_vm1, %v2082_v2, -inf }
  0x68   : > { %558 = vmax.xlane.f32.xlu0 %v557_v56 }
  0x6a   : > { %564 = vmax.xlane.f32.xlu2 %v563_v57  ;;  %561 = vmax.xlane.f32.xlu1 %v560_v11 }
  0x70   : > { %567 = vmax.xlane.f32.xlu0 %v566_v44 }
  0x72   : > { %570 = vmax.xlane.f32.xlu1 %v569_v7 }
  0x93   : > { %v2092_v56 = vpop.xlane.xlu0 %477 }
  0x94   : > { %v572_v57 = vsub.f32 %v1732_v16, %v2092_v56 }
  0x95   : > { %v2096_v11 = vpop.xlane.xlu2 %489  ;;  %v2098_v19 = vpop.xlane.xlu1 %483 }
  0x96   : > { %v604_v42 = vmul.f32 1.442695, %v572_v57  ;;  %v574_v20 = vsub.f32 %v1753_v23, %v2098_v19  ;;  %v576_v9 = vsub.f32 %v1749_v22, %v2096_v11 }
  0x98   : > { %1474 = vpow2.f32 %v604_v42  ;;  %v608_v54 = vmul.f32 1.442695, %v574_v20  ;;  %v612_v37 = vmul.f32 1.442695, %v576_v9 }
  0x9a   : > { %1476 = vpow2.f32 %v608_v54 }
  0x9b   : > { %v2102_v10 = vpop.xlane.xlu0 %480 }
  0x9c   : > { %v573_v7 = vsub.f32 %v1765_v29, %v2102_v10 }
  0x9d   : > { %v2106_v44 = vpop.xlane.xlu2 %492  ;;  %v2108_v43 = vpop.xlane.xlu1 %486 }
  0x9e   : > { %v1475_v0 = vpop.eup %1474  ;;  %v606_v57 = vmul.f32 1.442695, %v573_v7  ;;  %v577_v55 = vsub.f32 %v1774_v32, %v2106_v44  ;;  %v575_v54 = vsub.f32 %v1778_v33, %v2108_v43 }
  0x9f   : > { %v668_v42 = vsel %vm475_vm1, %v1475_v0, 0.0 }
  0xa0   : > { %1478 = vpow2.f32 %v606_v57  ;;  %v614_v20 = vmul.f32 1.442695, %v577_v55  ;;  %v610_v34 = vmul.f32 1.442695, %v575_v54  ;;  %669 = vadd.xlane.f32.xlu2 %v668_v42  ;;  %v1477_v25 = vpop.eup %1476 }
  0xa1   : > { %v674_v4 = vsel %vm475_vm1, %v1477_v25, 0.0 }
  0xa2   : > { %1480 = vpow2.f32 %v614_v20  ;;  %675 = vadd.xlane.f32.xlu1 %v674_v4 }
  0xa3   : > { %1482 = vpow2.f32 %v610_v34  ;;  %v2118_v7 = vpop.xlane.xlu0 %495 }
  0xa4   : > { %v578_v61 = vsub.f32 %v1803_v45, %v2118_v7  ;;  %1484 = vpow2.f32 %v612_v37 }
  0xa5   : > { %v2122_v6 = vpop.xlane.xlu2 %501  ;;  %v2124_v50 = vpop.xlane.xlu1 %498 }
  0xa6   : > { %v1479_v0 = vpop.eup %1478  ;;  %v580_v55 = vsub.f32 %v1810_v47, %v2122_v6  ;;  %v616_v9 = vmul.f32 1.442695, %v578_v61  ;;  %v579_v25 = vsub.f32 %v1814_v48, %v2124_v50 }
  0xa7   : > { %v671_v4 = vsel %vm475_vm1, %v1479_v0, 0.0 }
  0xa8   : > { %v1481_v34 = vpop.eup %1480  ;;  %v620_v57 = vmul.f32 1.442695, %v580_v55  ;;  %1486 = vpow2.f32 %v616_v9  ;;  %672 = vadd.xlane.f32.xlu0 %v671_v4  ;;  %v618_v54 = vmul.f32 1.442695, %v579_v25 }
  0xa9   : > { %v1483_v42 = vpop.eup %1482  ;;  %v683_v20 = vsel %vm475_vm1, %v1481_v34, 0.0 }
  0xaa   : > { %1488 = vpow2.f32 %v620_v57  ;;  %v677_v37 = vsel %vm475_vm1, %v1483_v42, 0.0  ;;  %684 = vadd.xlane.f32.xlu1 %v683_v20  ;;  %v1485_v61 = vpop.eup %1484 }
  0xab   : > { %678 = vadd.xlane.f32.xlu2 %v677_v37  ;;  %v2133_v46 = vpop.xlane.xlu0 %504  ;;  %1490 = vpow2.f32 %v618_v54  ;;  %v680_v57 = vsel %vm475_vm1, %v1485_v61, 0.0 }
  0xac   : > { %2783 = vst [vmem:[#allocation37_spill] sm:$0xff] %v2133_v46  ;;  %v581_v0 = vsub.f32 %v1839_v60, %v2133_v46 }
  0xad   : > { %v2137_v51 = vpop.xlane.xlu2 %510  ;;  %v2139_v55 = vpop.xlane.xlu1 %507 }
  0xae   : > { %2784 = vst [vmem:[#allocation38_spill] sm:$0xff] %v2137_v51  ;;  %v1487_v9 = vpop.eup %1486  ;;  %v583_v25 = vsub.f32 %v1846_v62, %v2137_v51  ;;  %v622_v4 = vmul.f32 1.442695, %v581_v0  ;;  %v582_v34 = vsub.f32 %v1850_v63, %v2139_v55 }
  0xaf   : > { %2785 = vst [vmem:[#allocation39_spill] sm:$0xff] %v2139_v55  ;;  %v686_v54 = vsel %vm475_vm1, %v1487_v9, 0.0 }
  0xb0   : > { %v1489_v42 = vpop.eup %1488  ;;  %v626_v20 = vmul.f32 1.442695, %v583_v25  ;;  %1492 = vpow2.f32 %v622_v4  ;;  %681 = vadd.xlane.f32.xlu0 %v680_v57  ;;  %v624_v37 = vmul.f32 1.442695, %v582_v34 }
  0xb1   : > { %v692_v46 = vsel %vm475_vm1, %v1489_v42, 0.0  ;;  %v1491_v60 = vpop.eup %1490 }
  0xb2   : > { %1494 = vpow2.f32 %v626_v20  ;;  %693 = vadd.xlane.f32.xlu1 %v692_v46  ;;  %v689_v25 = vsel %vm475_vm1, %v1491_v60, 0.0 }
  0xb3   : > { %687 = vadd.xlane.f32.xlu2 %v686_v54  ;;  %v2148_v51 = vpop.xlane.xlu0 %513  ;;  %1496 = vpow2.f32 %v624_v37 }
  0xb4   : > { %2786 = vst [vmem:[#allocation40_spill] sm:$0xff] %v2148_v51  ;;  %v584_v0 = vsub.f32 %v1875_v21, %v2148_v51 }
  0xb5   : > { %v2152_v61 = vpop.xlane.xlu2 %519  ;;  %v2155_v4 = vpop.xlane.xlu1 %516 }
  0xb6   : > { %2787 = vst [vmem:[#allocation41_spill] sm:$0xff] %v2152_v61  ;;  %v1493_v9 = vpop.eup %1492  ;;  %v586_v34 = vsub.f32 %v1883_v26, %v2152_v61  ;;  %v628_v57 = vmul.f32 1.442695, %v584_v0  ;;  %v585_v46 = vsub.f32 %v1887_v27, %v2155_v4 }
  0xb7   : > { %2788 = vst [vmem:[#allocation42_spill] sm:$0xff] %v2155_v4  ;;  %v695_v54 = vsel %vm475_vm1, %v1493_v9, 0.0 }
  0xb8   : > { %v1495_v42 = vpop.eup %1494  ;;  %v632_v20 = vmul.f32 1.442695, %v586_v34  ;;  %1498 = vpow2.f32 %v628_v57  ;;  %690 = vadd.xlane.f32.xlu0 %v689_v25  ;;  %v630_v37 = vmul.f32 1.442695, %v585_v46 }
  0xb9   : > { %v701_v51 = vsel %vm475_vm1, %v1495_v42, 0.0  ;;  %v1497_v60 = vpop.eup %1496 }
  0xba   : > { %1500 = vpow2.f32 %v632_v20  ;;  %702 = vadd.xlane.f32.xlu1 %v701_v51  ;;  %v698_v34 = vsel %vm475_vm1, %v1497_v60, 0.0 }
  0xbb   : > { %696 = vadd.xlane.f32.xlu2 %v695_v54  ;;  %v2163_v55 = vpop.xlane.xlu0 %522  ;;  %1502 = vpow2.f32 %v630_v37 }
  0xbc   : > { %2789 = vst [vmem:[#allocation43_spill] sm:$0xff] %v2163_v55  ;;  %v587_v0 = vsub.f32 %v1916_v53, %v2163_v55 }
  0xbd   : > { %v2167_v61 = vpop.xlane.xlu2 %528  ;;  %v2170_v25 = vpop.xlane.xlu1 %525 }
  0xbe   : > { %2790 = vst [vmem:[#allocation44_spill] sm:$0xff] %v2167_v61  ;;  %v1499_v9 = vpop.eup %1498  ;;  %v589_v57 = vsub.f32 %v1928_v58, %v2167_v61  ;;  %v634_v46 = vmul.f32 1.442695, %v587_v0  ;;  %v588_v51 = vsub.f32 %v1932_v59, %v2170_v25 }
  0xbf   : > { %2791 = vst [vmem:[#allocation45_spill] sm:$0xff] %v2170_v25  ;;  %v704_v54 = vsel %vm475_vm1, %v1499_v9, 0.0 }
  0xc0   : > { %v1501_v42 = vpop.eup %1500  ;;  %v638_v20 = vmul.f32 1.442695, %v589_v57  ;;  %1504 = vpow2.f32 %v634_v46  ;;  %699 = vadd.xlane.f32.xlu0 %v698_v34  ;;  %v636_v37 = vmul.f32 1.442695, %v588_v51 }
  0xc1   : > { %v710_v55 = vsel %vm475_vm1, %v1501_v42, 0.0  ;;  %v1503_v60 = vpop.eup %1502 }
  0xc2   : > { %1506 = vpow2.f32 %v638_v20  ;;  %711 = vadd.xlane.f32.xlu1 %v710_v55  ;;  %v707_v57 = vsel %vm475_vm1, %v1503_v60, 0.0 }
  0xc3   : > { %705 = vadd.xlane.f32.xlu2 %v704_v54  ;;  %v2178_v4 = vpop.xlane.xlu0 %531  ;;  %1508 = vpow2.f32 %v636_v37 }
  0xc4   : > { %2792 = vst [vmem:[#allocation46_spill] sm:$0xff] %v2178_v4  ;;  %v590_v0 = vsub.f32 %v1964_v41, %v2178_v4 }
  0xc5   : > { %v2182_v61 = vpop.xlane.xlu2 %537  ;;  %v2185_v34 = vpop.xlane.xlu1 %534 }
  0xc6   : > { %2793 = vst [vmem:[#allocation47_spill] sm:$0xff] %v2182_v61  ;;  %v1505_v9 = vpop.eup %1504  ;;  %v592_v46 = vsub.f32 %v1975_v49, %v2182_v61  ;;  %v640_v51 = vmul.f32 1.442695, %v590_v0  ;;  %v591_v55 = vsub.f32 %v1979_v52, %v2185_v34 }
  0xc7   : > { %2794 = vst [vmem:[#allocation48_spill] sm:$0xff] %v2185_v34  ;;  %v713_v54 = vsel %vm475_vm1, %v1505_v9, 0.0 }
  0xc8   : > { %v1507_v42 = vpop.eup %1506  ;;  %v644_v20 = vmul.f32 1.442695, %v592_v46  ;;  %1510 = vpow2.f32 %v640_v51  ;;  %708 = vadd.xlane.f32.xlu0 %v707_v57  ;;  %v642_v37 = vmul.f32 1.442695, %v591_v55 }
  0xc9   : > { %v719_v4 = vsel %vm475_vm1, %v1507_v42, 0.0  ;;  %v1509_v60 = vpop.eup %1508 }
  0xca   : > { %1512 = vpow2.f32 %v644_v20  ;;  %720 = vadd.xlane.f32.xlu1 %v719_v4  ;;  %v716_v46 = vsel %vm475_vm1, %v1509_v60, 0.0 }
  0xcb   : > { %714 = vadd.xlane.f32.xlu2 %v713_v54  ;;  %v2193_v25 = vpop.xlane.xlu0 %540  ;;  %1514 = vpow2.f32 %v642_v37 }
  0xcc   : > { %2795 = vst [vmem:[#allocation49_spill] sm:$0xff] %v2193_v25  ;;  %v593_v0 = vsub.f32 %v2006_v40, %v2193_v25 }
  0xcd   : > { %v2197_v61 = vpop.xlane.xlu2 %546  ;;  %v2200_v57 = vpop.xlane.xlu1 %543 }
  0xce   : > { %2796 = vst [vmem:[#allocation50_spill] sm:$0xff] %v2197_v61  ;;  %v1511_v9 = vpop.eup %1510  ;;  %v595_v51 = vsub.f32 %v2016_v3, %v2197_v61  ;;  %v646_v55 = vmul.f32 1.442695, %v593_v0  ;;  %v594_v4 = vsub.f32 %v2020_v1, %v2200_v57 }
  0xcf   : > { %2797 = vst [vmem:[#allocation51_spill] sm:$0xff] %v2200_v57  ;;  %v722_v54 = vsel %vm475_vm1, %v1511_v9, 0.0 }
  0xd0   : > { %v1513_v42 = vpop.eup %1512  ;;  %v650_v20 = vmul.f32 1.442695, %v595_v51  ;;  %1516 = vpow2.f32 %v646_v55  ;;  %717 = vadd.xlane.f32.xlu0 %v716_v46  ;;  %v648_v37 = vmul.f32 1.442695, %v594_v4 }
  0xd1   : > { %v728_v25 = vsel %vm475_vm1, %v1513_v42, 0.0  ;;  %v1515_v60 = vpop.eup %1514 }
  0xd2   : > { %1518 = vpow2.f32 %v650_v20  ;;  %729 = vadd.xlane.f32.xlu1 %v728_v25  ;;  %v725_v51 = vsel %vm475_vm1, %v1515_v60, 0.0  ;;  %v1645_v60 = vmov 0  }
  0xd3   : > { %723 = vadd.xlane.f32.xlu2 %v722_v54  ;;  %v2208_v34 = vpop.xlane.xlu0 %549  ;;  %1520 = vpow2.f32 %v648_v37  ;;  %1471 = vset.pattern.permute.xlu1 %v1645_v60 }
  0xd4   : > { %2798 = vst [vmem:[#allocation52_spill] sm:$0xff] %v2208_v34  ;;  %v596_v0 = vsub.f32 %v2036_v38, %v2208_v34  ;;  %1473 = vset.pattern.permute.xlu0 %v1645_v60  ;;  %1472 = vset.pattern.permute.xlu2 %v1645_v60 }
  0xd5   : > { %v2212_v61 = vpop.xlane.xlu2 %555  ;;  %v2215_v46 = vpop.xlane.xlu1 %552 }
  0xd6   : > { %2799 = vst [vmem:[#allocation53_spill] sm:$0xff] %v2212_v61  ;;  %v1517_v9 = vpop.eup %1516  ;;  %v598_v55 = vsub.f32 %v2040_v39, %v2212_v61  ;;  %v652_v4 = vmul.f32 1.442695, %v596_v0  ;;  %v597_v25 = vsub.f32 %v2044_v13, %v2215_v46 }
  0xd7   : > { %2800 = vst [vmem:[#allocation54_spill] sm:$0xff] %v2215_v46  ;;  %v731_v42 = vsel %vm475_vm1, %v1517_v9, 0.0 }
  0xd8   : > { %v1519_v20 = vpop.eup %1518  ;;  %v656_v54 = vmul.f32 1.442695, %v598_v55  ;;  %1522 = vpow2.f32 %v652_v4  ;;  %726 = vadd.xlane.f32.xlu0 %v725_v51  ;;  %v654_v37 = vmul.f32 1.442695, %v597_v25 }
  0xd9   : > { %v737_v34 = vsel %vm475_vm1, %v1519_v20, 0.0  ;;  %v1521_v57 = vpop.eup %1520 }
  0xda   : > { %1524 = vpow2.f32 %v656_v54  ;;  %738 = vadd.xlane.f32.xlu1 %v737_v34  ;;  %v734_v51 = vsel %vm475_vm1, %v1521_v57, 0.0 }
  0xdb   : > { %732 = vadd.xlane.f32.xlu2 %v731_v42  ;;  %v2223_v0 = vpop.xlane.xlu0 %558  ;;  %1526 = vpow2.f32 %v654_v37 }
  0xdc   : > { %2801 = vst [vmem:[#allocation55_spill] sm:$0xff] %v2223_v0  ;;  %v599_v9 = vsub.f32 %v2060_v31, %v2223_v0 }
  0xdd   : > { %v2227_v55 = vpop.xlane.xlu2 %564  ;;  %v2230_v4 = vpop.xlane.xlu1 %561 }
  0xde   : > { %2802 = vst [vmem:[#allocation56_spill] sm:$0xff] %v2227_v55  ;;  %v1523_v25 = vpop.eup %1522  ;;  %v601_v20 = vsub.f32 %v2064_v28, %v2227_v55  ;;  %v658_v54 = vmul.f32 1.442695, %v599_v9  ;;  %v600_v34 = vsub.f32 %v2068_v8, %v2230_v4 }
  0xdf   : > { %2803 = vst [vmem:[#allocation57_spill] sm:$0xff] %v2230_v4  ;;  %v740_v37 = vsel %vm475_vm1, %v1523_v25, 0.0 }
  0xe0   : > { %v1525_v42 = vpop.eup %1524  ;;  %v662_v60 = vmul.f32 1.442695, %v601_v20  ;;  %1528 = vpow2.f32 %v658_v54  ;;  %735 = vadd.xlane.f32.xlu0 %v734_v51  ;;  %v660_v0 = vmul.f32 1.442695, %v600_v34 }
  0xe1   : > { %v746_v61 = vsel %vm475_vm1, %v1525_v42, 0.0  ;;  %v1527_v57 = vpop.eup %1526 }
  0xe2   : > { %1530 = vpow2.f32 %v662_v60  ;;  %747 = vadd.xlane.f32.xlu1 %v746_v61  ;;  %v743_v4 = vsel %vm475_vm1, %v1527_v57, 0.0 }
  0xe3   : > { %741 = vadd.xlane.f32.xlu2 %v740_v37  ;;  %v2238_v46 = vpop.xlane.xlu0 %567  ;;  %1532 = vpow2.f32 %v660_v0 }
  0xe4   : > { %2804 = vst [vmem:[#allocation58_spill] sm:$0xff] %v2238_v46  ;;  %v602_v9 = vsub.f32 %v2082_v2, %v2238_v46 }
  0xe5   : > { %v2243_v20 = vpop.xlane.xlu1 %570 }
  0xe6   : > { %2805 = vst [vmem:[#allocation59_spill] sm:$0xff] %v2243_v20  ;;  %v1529_v51 = vpop.eup %1528  ;;  %v664_v54 = vmul.f32 1.442695, %v602_v9  ;;  %v603_v25 = vsub.f32 %v2086_v24, %v2243_v20 }
  0xe7   : > { %v749_v61 = vsel %vm475_vm1, %v1529_v51, 0.0 }
  0xe8   : > { %v1531_v34 = vpop.eup %1530  ;;  %1534 = vpow2.f32 %v664_v54  ;;  %744 = vadd.xlane.f32.xlu0 %v743_v4  ;;  %v666_v42 = vmul.f32 1.442695, %v603_v25  ;;  %v248_v54 = vld [vmem:[%s1699_s26] sm:$0xff]  ;;  %v249_v25 = vld [vmem:[%s1699_s26 + $0x8] sm:$0xff] }
  0xe9   : > { %v755_v0 = vsel %vm475_vm1, %v1531_v34, 0.0  ;;  %v1533_v60 = vpop.eup %1532  ;;  %v252_v34 = vld [vmem:[%s1699_s26 + $0x20] sm:$0xff] }
  0xea   : > { %756 = vadd.xlane.f32.xlu1 %v755_v0  ;;  %1536 = vpow2.f32 %v666_v42  ;;  %v752_v37 = vsel %vm475_vm1, %v1533_v60, 0.0  ;;  %v250_v0 = vld [vmem:[%s1699_s26 + $0x10] sm:$0xff] }
  0xeb   : > { %750 = vadd.xlane.f32.xlu2 %v749_v61  ;;  %v251_v61 = vld [vmem:[%s1699_s26 + $0x18] sm:$0xff] }
  0xee   : > { %v1535_v57 = vpop.eup %1534 }
  0xef   : > { %v758_v4 = vsel %vm475_vm1, %v1535_v57, 0.0 }
  0xf0   : > { %753 = vadd.xlane.f32.xlu0 %v752_v37  ;;  %v1537_v9 = vpop.eup %1536  ;;  %v253_v37 = vld [vmem:[%s1699_s26 + $0x28] sm:$0xff] }
  0xf1   : > { %v761_v51 = vsel %vm475_vm1, %v1537_v9, 0.0 }
  0xf3   : > { %759 = vadd.xlane.f32.xlu2 %v758_v4 }
  0xf8   : > { %762 = vadd.xlane.f32.xlu0 %v761_v51 }
 0x103   : > { %863 = vperm.xlu1 %1471, %v248_v54  }
 0x10b   : > { %866 = vperm.xlu2 %1472, %v249_v25   ;;  %875 = vperm.xlu1 %1471, %v252_v34  }
 0x10c   : > { %869 = vperm.xlu0 %1473, %v250_v0  }
 0x113   : > { %872 = vperm.xlu2 %1472, %v251_v61   ;;  %v2257_v42 = vpop.xlane.xlu2 %669 }
 0x115   : > { %v2259_v60 = vpop.xlane.xlu1 %675 }
 0x11b   : > { %v2262_v57 = vpop.xlane.xlu0 %672  ;;  %878 = vperm.xlu2 %1472, %v253_v37  }
 0x11c   : > { %1538 = vlog2.f32 %v2262_v57  ;;  %v277_v57 = vld [vmem:[%s1699_s26 + $0xe8] sm:$0xff] }
 0x11d   : > { %v2264_v4 = vpop.xlane.xlu1 %684  ;;  %1540 = vlog2.f32 %v2257_v42 }
 0x11e   : > { %v2266_v9 = vpop.xlane.xlu2 %678  ;;  %1542 = vlog2.f32 %v2264_v4 }
 0x11f   : > { %1544 = vlog2.f32 %v2266_v9 }
 0x120   : > { %1546 = vlog2.f32 %v2259_v60 }
 0x123   : > { %v2268_v51 = vpop.xlane.xlu0 %681 }
 0x124   : > { %1548 = vlog2.f32 %v2268_v51 }
 0x125   : > { %v2272_v25 = vpop.xlane.xlu1 %693 }
 0x126   : > { %v2270_v54 = vpop.xlane.xlu2 %687 }
 0x12b   : > { %v2274_v34 = vpop.xlane.xlu0 %690 }
 0x12c   : > { %1550 = vlog2.f32 %v2274_v34 }
 0x12d   : > { %v2278_v61 = vpop.xlane.xlu1 %702  ;;  %1552 = vlog2.f32 %v2270_v54 }
 0x12e   : > { %v2276_v0 = vpop.xlane.xlu2 %696  ;;  %2807 = vst [vmem:[#allocation61_spill] sm:$0xff] %v2278_v61  ;;  %1554 = vlog2.f32 %v2272_v25 }
 0x12f   : > { %2806 = vst [vmem:[#allocation60_spill] sm:$0xff] %v2276_v0 }
 0x133   : > { %v2280_v20 = vpop.xlane.xlu0 %699 }
 0x134   : > { %2808 = vst [vmem:[#allocation62_spill] sm:$0xff] %v2280_v20 }
 0x135   : > { %v2286_v55 = vpop.xlane.xlu1 %711 }
 0x136   : > { %v2282_v46 = vpop.xlane.xlu2 %705  ;;  %2811 = vst [vmem:[#allocation65_spill] sm:$0xff] %v2286_v55 }
 0x137   : > { %2809 = vst [vmem:[#allocation63_spill] sm:$0xff] %v2282_v46 }
 0x13b   : > { %v2284_v37 = vpop.xlane.xlu0 %708 }
 0x13c   : > { %2810 = vst [vmem:[#allocation64_spill] sm:$0xff] %v2284_v37 }
 0x13d   : > { %v2292_v8 = vpop.xlane.xlu1 %720 }
 0x13e   : > { %v2288_v24 = vpop.xlane.xlu2 %714  ;;  %2814 = vst [vmem:[#allocation68_spill] sm:$0xff] %v2292_v8 }
 0x13f   : > { %2812 = vst [vmem:[#allocation66_spill] sm:$0xff] %v2288_v24 }
 0x143   : > { %v2290_v2 = vpop.xlane.xlu0 %717 }
 0x144   : > { %2813 = vst [vmem:[#allocation67_spill] sm:$0xff] %v2290_v2 }
 0x145   : > { %v2300_v61 = vpop.xlane.xlu1 %729 }
 0x146   : > { %v2294_v28 = vpop.xlane.xlu2 %723  ;;  %2818 = vst [vmem:[#allocation72_spill] sm:$0xff] %v2300_v61 }
 0x147   : > { %2815 = vst [vmem:[#allocation69_spill] sm:$0xff] %v2294_v28  ;;  %v2826_v28 = vlaneseq }
 0x14b   : > { %v2298_v0 = vpop.xlane.xlu0 %726 }
 0x14c   : > { %2817 = vst [vmem:[#allocation71_spill] sm:$0xff] %v2298_v0 }
 0x14d   : > { %v2306_v37 = vpop.xlane.xlu1 %738 }
 0x14e   : > { %v2296_v31 = vpop.xlane.xlu2 %732  ;;  %2821 = vst [vmem:[#allocation75_spill] sm:$0xff] %v2306_v37 }
 0x14f   : > { %2816 = vst [vmem:[#allocation70_spill] sm:$0xff] %v2296_v31  ;;  %v2317_v31 = vand.u32 127, %v2826_v28 }
 0x153   : > { %v2304_v46 = vpop.xlane.xlu0 %735 }
 0x154   : > { %2820 = vst [vmem:[#allocation74_spill] sm:$0xff] %v2304_v46  ;;  %v1646_v46 = vmov 0.0  }
 0x155   : > { %v2312_v2 = vpop.xlane.xlu1 %747 }
 0x156   : > { %v2302_v20 = vpop.xlane.xlu2 %741  ;;  %2824 = vst [vmem:[#allocation78_spill] sm:$0xff] %v2312_v2 }
 0x157   : > { %2819 = vst [vmem:[#allocation73_spill] sm:$0xff] %v2302_v20 }
 0x15b   : > { %v2310_v24 = vpop.xlane.xlu0 %744 }
 0x15c   : > { %2823 = vst [vmem:[#allocation77_spill] sm:$0xff] %v2310_v24 }
 0x15d   : > { %v2321_v61 = vpop.xlane.xlu1 %756 }
 0x15e   : > { %v2308_v55 = vpop.xlane.xlu2 %750  ;;  %2828 = vst [vmem:[#allocation81_spill] sm:$0xff] %v2321_v61 }
 0x15f   : > { %2822 = vst [vmem:[#allocation76_spill] sm:$0xff] %v2308_v55 }
 0x163   : > { %v2319_v0 = vpop.xlane.xlu0 %753 }
 0x164   : > { %2827 = vst [vmem:[#allocation80_spill] sm:$0xff] %v2319_v0 }
 0x166   : > { %v2314_v8 = vpop.xlane.xlu2 %759 }
 0x167   : > { %2825 = vst [vmem:[#allocation79_spill] sm:$0xff] %v2314_v8 }
 0x16b   : > { %v2327_v39 = vpop.xlane.xlu0 %762 }
 0x16e   : > { %v867_v20 = vpop.permute.xlu2 %866 }
 0x16f   : > { %vm959_vm0 = vcmp.eq.s32.totalorder %v2317_v31, %v867_v20 }
 0x170   : > { %v1414_v37 = vsel %vm959_vm0, 1.0, %v1646_v46 }
 0x171   : > { %v1055_v55 = vmul.f32 %v1414_v37, %v1765_v29 }
 0x173   : > { %v1089_v24 = vsel %vm475_vm1, %v1055_v55, 0.0 }
 0x174   : > { %1090 = vadd.xlane.f32.xlu2 %v1089_v24 }
 0x175   : > { %v864_v2 = vpop.permute.xlu1 %863 }
 0x176   : > { %v873_v8 = vpop.permute.xlu2 %872  ;;  %vm958_vm15 = vcmp.eq.s32.totalorder %v2317_v31, %v864_v2 }
 0x177   : > { %vm961_vm14 = vcmp.eq.s32.totalorder %v2317_v31, %v873_v8  ;;  %v1413_v28 = vsel %vm958_vm15, 1.0, %v1646_v46 }
 0x178   : > { %v1054_v20 = vmul.f32 %v1413_v28, %v1732_v16  ;;  %v1416_v0 = vsel %vm961_vm14, 1.0, %v1646_v46 }
 0x179   : > { %v1057_v29 = vmul.f32 %v1416_v0, %v1778_v33 }
 0x17a   : > { %v1086_v61 = vsel %vm475_vm1, %v1054_v20, 0.0 }
 0x17b   : > { %1087 = vadd.xlane.f32.xlu0 %v1086_v61  ;;  %v1095_v16 = vsel %vm475_vm1, %v1057_v29, 0.0 }
 0x17d   : > { %v876_v55 = vpop.permute.xlu1 %875 }
 0x17e   : > { %v879_v24 = vpop.permute.xlu2 %878  ;;  %v870_v37 = vpop.permute.xlu0 %869  ;;  %vm962_vm14 = vcmp.eq.s32.totalorder %v2317_v31, %v876_v55  ;;  %v254_v55 = vld [vmem:[%s1699_s26 + $0x30] sm:$0xff] }
 0x17f   : > { %vm963_vm0 = vcmp.eq.s32.totalorder %v2317_v31, %v879_v24  ;;  %vm960_vm12 = vcmp.eq.s32.totalorder %v2317_v31, %v870_v37  ;;  %v1417_v20 = vsel %vm962_vm14, 1.0, %v1646_v46  ;;  %v258_v24 = vld [vmem:[%s1699_s26 + $0x50] sm:$0xff]  ;;  %v261_v37 = vld [vmem:[%s1699_s26 + $0x68] sm:$0xff] }
 0x180   : > { %v1418_v2 = vsel %vm963_vm0, 1.0, %v1646_v46  ;;  %v1415_v8 = vsel %vm960_vm12, 1.0, %v1646_v46  ;;  %v1058_v29 = vmul.f32 %v1417_v20, %v1749_v22  ;;  %v264_v22 = vld [vmem:[%s1699_s26 + $0x80] sm:$0xff]  ;;  %vm1247_vm12 = vcmask 7168  }
 0x181   : > { %v1059_v61 = vmul.f32 %v1418_v2, %v1774_v32  ;;  %v1056_v33 = vmul.f32 %v1415_v8, %v1753_v23  ;;  %v255_v23 = vld [vmem:[%s1699_s26 + $0x38] sm:$0xff]  ;;  %v256_v2 = vld [vmem:[%s1699_s26 + $0x40] sm:$0xff] }
 0x182   : > { %v1098_v32 = vsel %vm475_vm1, %v1058_v29, 0.0  ;;  %v259_v8 = vld [vmem:[%s1699_s26 + $0x58] sm:$0xff]  ;;  %v268_v20 = vld [vmem:[%s1699_s26 + $0xa0] sm:$0xff]  ;;  %v278_v29 = vld [vmem:[%s1699_s26 + $0xf0] sm:$0xff] }
 0x183   : > { %v1101_v0 = vsel %vm475_vm1, %v1059_v61, 0.0  ;;  %1096 = vadd.xlane.f32.xlu0 %v1095_v16  ;;  %v1092_v28 = vsel %vm475_vm1, %v1056_v33, 0.0  ;;  %v267_v16 = vld [vmem:[%s1699_s26 + $0x98] sm:$0xff]  ;;  %v262_v61 = vld [vmem:[%s1699_s26 + $0x70] sm:$0xff] }
 0x184   : > { %1102 = vadd.xlane.f32.xlu2 %v1101_v0  ;;  %1093 = vadd.xlane.f32.xlu1 %v1092_v28  ;;  %v270_v33 = vld [vmem:[%s1699_s26 + $0xb0] sm:$0xff]  ;;  %v265_v0 = vld [vmem:[%s1699_s26 + $0x88] sm:$0xff] }
 0x185   : > { %v273_v28 = vld [vmem:[%s1699_s26 + $0xc8] sm:$0xff] }
 0x18c   : > { %1099 = vadd.xlane.f32.xlu1 %v1098_v32  ;;  %v271_v32 = vld [vmem:[%s1699_s26 + $0xb8] sm:$0xff] }
 0x19c   : > { %884 = vperm.xlu2 %1472, %v255_v23   ;;  %v272_v23 = vld [vmem:[%s1699_s26 + $0xc0] sm:$0xff] }
 0x1a4   : > { %893 = vperm.xlu2 %1472, %v258_v24   ;;  %v1539_v24 = vpop.eup %1538 }
 0x1a5   : > { %881 = vperm.xlu1 %1471, %v254_v55   ;;  %v767_v55 = vmul.f32 0.6931472, %v1539_v24 }
 0x1ac   : > { %902 = vperm.xlu2 %1472, %v261_v37   ;;  %v275_v37 = vld [vmem:[%s1699_s26 + $0xd8] sm:$0xff] }
 0x1ad   : > { %887 = vperm.xlu1 %1471, %v256_v2   ;;  %v829_v2 = vadd.f32 %v767_v55, %v2102_v10 }
 0x1b4   : > { %911 = vperm.xlu2 %1472, %v264_v22   ;;  %v1541_v22 = vpop.eup %1540 }
 0x1b5   : > { %896 = vperm.xlu1 %1471, %v259_v8  }
 0x1bc   : > { %920 = vperm.xlu2 %1472, %v267_v16  }
 0x1bd   : > { %905 = vperm.xlu1 %1471, %v262_v61   ;;  %v765_v61 = vmul.f32 0.6931472, %v1541_v22 }
 0x1bf   : > { %v828_v42 = vadd.f32 %v765_v61, %v2092_v56 }
 0x1c4   : > { %929 = vperm.xlu2 %1472, %v270_v33   ;;  %v1543_v33 = vpop.eup %1542 }
 0x1c5   : > { %914 = vperm.xlu1 %1471, %v265_v0   ;;  %v1545_v0 = vpop.eup %1544  ;;  %v775_v4 = vmul.f32 0.6931472, %v1543_v33 }
 0x1c7   : > { %v833_v55 = vadd.f32 %v775_v4, %v2106_v44 }
 0x1cc   : > { %938 = vperm.xlu2 %1472, %v273_v28  }
 0x1cd   : > { %923 = vperm.xlu1 %1471, %v268_v20   ;;  %v1547_v20 = vpop.eup %1546 }
 0x1ce   : > { %v769_v9 = vmul.f32 0.6931472, %v1547_v20 }
 0x1d0   : > { %v830_v22 = vadd.f32 %v769_v9, %v2098_v19 }
 0x1d4   : > { %953 = vperm.xlu2 %1472, %v278_v29  }
 0x1d5   : > { %932 = vperm.xlu1 %1471, %v271_v32   ;;  %v771_v32 = vmul.f32 0.6931472, %v1545_v0 }
 0x1dd   : > { %935 = vperm.xlu1 %1471, %v272_v23  }
 0x1e5   : > { %944 = vperm.xlu1 %1471, %v275_v37   ;;  %v831_v37 = vadd.f32 %v771_v32, %v2108_v43 }
 0x1e7   : > { %v1091_v8 = vpop.xlane.xlu2 %1090 }
 0x1e8   : > { %v1183_v16 = vsub.f32 %v829_v2, %v1091_v8  ;;  %v1549_v8 = vpop.eup %1548 }
 0x1ea   : > { %v1215_v10 = vsel %vm348_vm5, %v1183_v16, 0.0 }
 0x1eb   : > { %v1249_v23 = vsel %vm1247_vm12, %v1215_v10, 0.0 }
 0x1ed   : > { %950 = vperm.xlu1 %1471, %v277_v57   ;;  %v773_v57 = vmul.f32 0.6931472, %v1549_v8 }
 0x1ee   : > { %v1088_v28 = vpop.xlane.xlu0 %1087 }
 0x1ef   : > { %v1182_v29 = vsub.f32 %v828_v42, %v1088_v28  ;;  %v832_v28 = vadd.f32 %v773_v57, %v2096_v11 }
 0x1f1   : > { %v1214_v60 = vsel %vm347_vm2, %v1182_v29, 0.0 }
 0x1f2   : > { %v1248_v56 = vsel %vm1247_vm12, %v1214_v60, 0.0 }
 0x1f3   : > { %v1250_v24 = vadd.f32 %v1249_v23, %v1248_v56 }
 0x1f6   : > { %v1097_v2 = vpop.xlane.xlu0 %1096 }
 0x1f7   : > { %v1103_v15 = vpop.xlane.xlu2 %1102  ;;  %v1185_v51 = vsub.f32 %v831_v37, %v1097_v2  ;;  %v1094_v61 = vpop.xlane.xlu1 %1093 }
 0x1f8   : > { %v1187_v16 = vsub.f32 %v833_v55, %v1103_v15  ;;  %v1184_v5 = vsub.f32 %v830_v22, %v1094_v61 }
 0x1f9   : > { %v1217_v33 = vsel %vm350_vm7, %v1185_v51, 0.0 }
 0x1fa   : > { %v1216_v42 = vsel %vm349_vm4, %v1184_v5, 0.0  ;;  %v1253_v43 = vsel %vm1247_vm12, %v1217_v33, 0.0  ;;  %v1219_v29 = vsel %vm352_vm6, %v1187_v16, 0.0 }
 0x1fb   : > { %v1251_v44 = vsel %vm1247_vm12, %v1216_v42, 0.0  ;;  %v1257_v32 = vsel %vm1247_vm12, %v1219_v29, 0.0  ;;  %v269_v29 = vld [vmem:[%s1699_s26 + $0xa8] sm:$0xff] }
 0x1fc   : > { %v1252_v0 = vadd.f32 %v1251_v44, %v1250_v24 }
 0x1fe   : > { %v1254_v19 = vadd.f32 %v1253_v43, %v1252_v0 }
 0x1ff   : > { %v1100_v20 = vpop.xlane.xlu1 %1099  ;;  %v885_v9 = vpop.permute.xlu2 %884 }
 0x200   : > { %v1186_v10 = vsub.f32 %v832_v28, %v1100_v20  ;;  %vm965_vm2 = vcmp.eq.s32.totalorder %v2317_v31, %v885_v9  ;;  %v266_v20 = vld [vmem:[%s1699_s26 + $0x90] sm:$0xff] }
 0x201   : > { %v1420_v11 = vsel %vm965_vm2, 1.0, %v1646_v46 }
 0x202   : > { %v1218_v18 = vsel %vm351_vm3, %v1186_v10, 0.0  ;;  %v1061_v56 = vmul.f32 %v1420_v11, %v1814_v48 }
 0x203   : > { %v1255_v4 = vsel %vm1247_vm12, %v1218_v18, 0.0 }
 0x204   : > { %v1256_v14 = vadd.f32 %v1255_v4, %v1254_v19  ;;  %v1107_v12 = vsel %vm475_vm1, %v1061_v56, 0.0  ;;  %v260_v19 = vld [vmem:[%s1699_s26 + $0x60] sm:$0xff]  ;;  %v274_v4 = vld [vmem:[%s1699_s26 + $0xd0] sm:$0xff]  ;;  %v1551_v56 = vpop.eup %1550 }
 0x206   : > { %v2397_v60 = vadd.f32 %v1257_v32, %v1256_v14  ;;  %v276_v14 = vld [vmem:[%s1699_s26 + $0xe0] sm:$0xff]  ;;  %v279_v32 = vld [vmem:[%s1699_s26 + $0xf8] sm:$0xff] }
 0x207   : > { %v894_v23 = vpop.permute.xlu2 %893 }
 0x208   : > { %vm968_vm4 = vcmp.eq.s32.totalorder %v2317_v31, %v894_v23 }
 0x209   : > { %v1423_v17 = vsel %vm968_vm4, 1.0, %v1646_v46 }
 0x20a   : > { %v1064_v15 = vmul.f32 %v1423_v17, %v1850_v63  ;;  %v779_v17 = vmul.f32 0.6931472, %v1551_v56 }
 0x20c   : > { %v1116_v48 = vsel %vm475_vm1, %v1064_v15, 0.0 }
 0x217   : > { %1108 = vadd.xlane.f32.xlu1 %v1107_v12  ;;  %v882_v24 = vpop.permute.xlu1 %881  ;;  %v1553_v12 = vpop.eup %1552 }
 0x218   : > { %vm964_vm3 = vcmp.eq.s32.totalorder %v2317_v31, %v882_v24  ;;  %v777_v24 = vmul.f32 0.6931472, %v1553_v12 }
 0x219   : > { %v1419_v55 = vsel %vm964_vm3, 1.0, %v1646_v46 }
 0x21a   : > { %v1060_v37 = vmul.f32 %v1419_v55, %v1803_v45  ;;  %v903_v45 = vpop.permute.xlu2 %902 }
 0x21b   : > { %vm971_vm7 = vcmp.eq.s32.totalorder %v2317_v31, %v903_v45 }
 0x21c   : > { %v1104_v2 = vsel %vm475_vm1, %v1060_v37, 0.0  ;;  %v835_v37 = vadd.f32 %v779_v17, %v2124_v50 }
 0x21d   : > { %1105 = vadd.xlane.f32.xlu0 %v1104_v2  ;;  %v834_v2 = vadd.f32 %v777_v24, %v2118_v7 }
 0x21f   : > { %1117 = vadd.xlane.f32.xlu1 %v1116_v48  ;;  %v888_v22 = vpop.permute.xlu1 %887  ;;  %v1555_v48 = vpop.eup %1554 }
 0x220   : > { %vm966_vm5 = vcmp.eq.s32.totalorder %v2317_v31, %v888_v22  ;;  %v781_v34 = vmul.f32 0.6931472, %v1555_v48 }
 0x221   : > { %v1421_v8 = vsel %vm966_vm5, 1.0, %v1646_v46 }
 0x222   : > { %v1062_v16 = vmul.f32 %v1421_v8, %v1810_v47  ;;  %v1426_v47 = vsel %vm971_vm7, 1.0, %v1646_v46  ;;  %v836_v50 = vadd.f32 %v781_v34, %v2122_v6  ;;  %v912_v30 = vpop.permute.xlu2 %911 }
 0x223   : > { %v1067_v42 = vmul.f32 %v1426_v47, %v1887_v27  ;;  %v263_v27 = vld [vmem:[%s1699_s26 + $0x78] sm:$0xff] }
 0x224   : > { %v1110_v51 = vsel %vm475_vm1, %v1062_v16, 0.0 }
 0x225   : > { %1111 = vadd.xlane.f32.xlu0 %v1110_v51  ;;  %v1125_v44 = vsel %vm475_vm1, %v1067_v42, 0.0 }
 0x227   : > { %v897_v61 = vpop.permute.xlu1 %896 }
 0x228   : > { %vm969_vm6 = vcmp.eq.s32.totalorder %v2317_v31, %v897_v61 }
 0x229   : > { %v1424_v63 = vsel %vm969_vm6, 1.0, %v1646_v46 }
 0x22a   : > { %v1065_v5 = vmul.f32 %v1424_v63, %v1846_v62  ;;  %v257_v62 = vld [vmem:[%s1699_s26 + $0x48] sm:$0xff] }
 0x22c   : > { %v1119_v57 = vsel %vm475_vm1, %v1065_v5, 0.0 }
 0x22d   : > { %1120 = vadd.xlane.f32.xlu1 %v1119_v57 }
 0x22f   : > { %v906_v33 = vpop.permute.xlu1 %905 }
 0x230   : > { %vm972_vm15 = vcmp.eq.s32.totalorder %v2317_v31, %v906_v33  ;;  %v2829_v33 = vld [vmem:[#allocation10_spill] sm:$0xff] }
 0x231   : > { %v1427_v0 = vsel %vm972_vm15, 1.0, %v1646_v46 }
 0x232   : > { %v1068_v43 = vmul.f32 %v1427_v0, %v1883_v26 }
 0x234   : > { %v1128_v28 = vsel %vm475_vm1, %v1068_v43, 0.0 }
 0x235   : > { %1126 = vadd.xlane.f32.xlu1 %v1125_v44 }
 0x237   : > { %v2431_v10 = vpop.permute.xlu1 %914 }
 0x238   : > { %vm975_vm14 = vcmp.eq.s32.totalorder %v2317_v31, %v2431_v10 }
 0x239   : > { %890 = vperm.xlu0 %1473, %v257_v62  }
 0x23d   : > { %1129 = vadd.xlane.f32.xlu1 %v1128_v28 }
 0x23f   : > { %v2434_v18 = vpop.permute.xlu1 %923 }
 0x240   : > { %vm978_vm3 = vcmp.eq.s32.totalorder %v2317_v31, %v2434_v18 }
 0x241   : > { %899 = vperm.xlu0 %1473, %v260_v19  }
 0x247   : > { %v2437_v26 = vpop.permute.xlu1 %932 }
 0x248   : > { %vm981_vm7 = vcmp.eq.s32.totalorder %v2317_v31, %v2437_v26 }
 0x249   : > { %908 = vperm.xlu0 %1473, %v263_v27  }
 0x24f   : > { %v2441_v9 = vpop.permute.xlu1 %935 }
 0x250   : > { %vm982_vm15 = vcmp.eq.s32.totalorder %v2317_v31, %v2441_v9 }
 0x251   : > { %917 = vperm.xlu0 %1473, %v266_v20   ;;  %v1437_v26 = vsel %vm982_vm15, 1.0, %v1646_v46 }
 0x257   : > { %v2443_v11 = vpop.permute.xlu1 %944 }
 0x259   : > { %926 = vperm.xlu0 %1473, %v269_v29   ;;  %v921_v29 = vpop.permute.xlu2 %920 }
 0x25a   : > { %vm977_vm4 = vcmp.eq.s32.totalorder %v2317_v31, %v921_v29 }
 0x25b   : > { %v1432_v24 = vsel %vm977_vm4, 1.0, %v1646_v46 }
 0x25f   : > { %v2447_v23 = vpop.permute.xlu1 %950 }
 0x261   : > { %941 = vperm.xlu0 %1473, %v274_v4  }
 0x269   : > { %947 = vperm.xlu0 %1473, %v276_v14  }
 0x271   : > { %956 = vperm.xlu0 %1473, %v279_v32  }
 0x28a   : > { %v1109_v55 = vpop.xlane.xlu1 %1108 }
 0x28b   : > { %v1189_v15 = vsub.f32 %v835_v37, %v1109_v55  ;;  %v1433_v55 = vsel %vm978_vm3, 1.0, %v1646_v46  ;;  %v1073_v37 = vmul.f32 %v1432_v24, %v1979_v52  ;;  %v2841_v24 = vld [vmem:[#allocation63_spill] sm:$0xff] }
 0x28c   : > { %v1074_v18 = vmul.f32 %v1433_v55, %v1975_v49 }
 0x28d   : > { %v1221_v54 = vsel %vm354_vm10, %v1189_v15, 0.0  ;;  %vm974_vm10 = vcmp.eq.s32.totalorder %v2317_v31, %v912_v30 }
 0x28e   : > { %v1261_v45 = vsel %vm1247_vm12, %v1221_v54, 0.0  ;;  %v1429_v44 = vsel %vm974_vm10, 1.0, %v1646_v46  ;;  %v1146_v48 = vsel %vm475_vm1, %v1074_v18, 0.0  ;;  %v1078_v54 = vmul.f32 %v1437_v26, %v2036_v38  ;;  %v2842_v18 = vld [vmem:[#allocation39_spill] sm:$0xff] }
 0x28f   : > { %v1070_v0 = vmul.f32 %v1429_v44, %v1932_v59  ;;  %v2833_v44 = vld [vmem:[#allocation34_spill] sm:$0xff] }
 0x290   : > { %v1106_v22 = vpop.xlane.xlu0 %1105 }
 0x291   : > { %v1188_v8 = vsub.f32 %v834_v2, %v1106_v22  ;;  %v1134_v28 = vsel %vm475_vm1, %v1070_v0, 0.0  ;;  %v1143_v2 = vsel %vm475_vm1, %v1073_v37, 0.0  ;;  %v1436_v22 = vsel %vm981_vm7, 1.0, %v1646_v46  ;;  %v2834_v0 = vld [vmem:[#allocation35_spill] sm:$0xff] }
 0x292   : > { %v1077_v9 = vmul.f32 %v1436_v22, %v2016_v3  ;;  %v2844_v22 = vld [vmem:[#allocation37_spill] sm:$0xff] }
 0x293   : > { %v1220_v16 = vsel %vm353_vm8, %v1188_v8, 0.0 }
 0x294   : > { %v1259_v51 = vsel %vm1247_vm12, %v1220_v16, 0.0 }
 0x295   : > { %v1260_v25 = vadd.f32 %v1259_v51, %v2397_v60  ;;  %v1155_v51 = vsel %vm475_vm1, %v1077_v9, 0.0 }
 0x297   : > { %v1262_v61 = vadd.f32 %v1261_v45, %v1260_v25 }
 0x298   : > { %v1112_v7 = vpop.xlane.xlu0 %1111 }
 0x299   : > { %v1190_v63 = vsub.f32 %v836_v50, %v1112_v7 }
 0x29b   : > { %v1222_v5 = vsel %vm355_vm9, %v1190_v63, 0.0  ;;  %v2831_v63 = vld [vmem:[#allocation32_spill] sm:$0xff] }
 0x29c   : > { %v1263_v36 = vsel %vm1247_vm12, %v1222_v5, 0.0 }
 0x29d   : > { %v2463_v57 = vadd.f32 %v1263_v36, %v1262_v61 }
 0x2ab   : > { %v891_v47 = vpop.permute.xlu0 %890 }
 0x2ac   : > { %vm967_vm8 = vcmp.eq.s32.totalorder %v2317_v31, %v891_v47 }
 0x2ad   : > { %v1422_v60 = vsel %vm967_vm8, 1.0, %v1646_v46 }
 0x2ae   : > { %v1063_v6 = vmul.f32 %v1422_v60, %v2829_v33 }
 0x2b0   : > { %v1113_v42 = vsel %vm475_vm1, %v1063_v6, 0.0  ;;  %v2832_v6 = vld [vmem:[#allocation33_spill] sm:$0xff] }
 0x2b1   : > { %1114 = vadd.xlane.f32.xlu2 %v1113_v42 }
 0x2b3   : > { %v900_v35 = vpop.permute.xlu0 %899 }
 0x2b4   : > { %vm970_vm9 = vcmp.eq.s32.totalorder %v2317_v31, %v900_v35 }
 0x2b5   : > { %v1425_v62 = vsel %vm970_vm9, 1.0, %v1646_v46  ;;  %vm985_vm9 = vcmp.eq.s32.totalorder %v2317_v31, %v2443_v11  ;;  %v2830_v11 = vld [vmem:[#allocation31_spill] sm:$0xff] }
 0x2b6   : > { %v1066_v43 = vmul.f32 %v1425_v62, %v1875_v21  ;;  %v1430_v21 = vsel %vm975_vm14, 1.0, %v1646_v46  ;;  %v1440_v3 = vsel %vm985_vm9, 1.0, %v1646_v46 }
 0x2b7   : > { %v1071_v32 = vmul.f32 %v1430_v21, %v1928_v58  ;;  %v1081_v5 = vmul.f32 %v1440_v3, %v2831_v63  ;;  %v2836_v21 = vld [vmem:[#allocation62_spill] sm:$0xff] }
 0x2b8   : > { %v1122_v19 = vsel %vm475_vm1, %v1066_v43, 0.0  ;;  %1556 = vlog2.f32 %v2836_v21  ;;  %v2851_v63 = vld [vmem:[#allocation42_spill] sm:$0xff]  ;;  %v2858_v21 = vld [vmem:[#allocation11_spill] sm:$0xff] }
 0x2b9   : > { %1135 = vadd.xlane.f32.xlu2 %v1134_v28  ;;  %1123 = vadd.xlane.f32.xlu0 %v1122_v19  ;;  %v1137_v12 = vsel %vm475_vm1, %v1071_v32, 0.0 }
 0x2bb   : > { %v909_v27 = vpop.permute.xlu0 %908 }
 0x2bc   : > { %vm973_vm0 = vcmp.eq.s32.totalorder %v2317_v31, %v909_v27 }
 0x2bd   : > { %v1428_v20 = vsel %vm973_vm0, 1.0, %v1646_v46  ;;  %vm987_vm0 = vcmp.eq.s32.totalorder %v2317_v31, %v2447_v23 }
 0x2be   : > { %v1069_v59 = vmul.f32 %v1428_v20, %v1916_v53  ;;  %v930_v53 = vpop.permute.xlu2 %929  ;;  %v1442_v47 = vsel %vm987_vm0, 1.0, %v1646_v46  ;;  %v2835_v20 = vld [vmem:[#allocation36_spill] sm:$0xff] }
 0x2bf   : > { %vm980_vm6 = vcmp.eq.s32.totalorder %v2317_v31, %v930_v53  ;;  %v1083_v42 = vmul.f32 %v1442_v47, %v2832_v6  ;;  %v2839_v53 = vld [vmem:[#allocation64_spill] sm:$0xff] }
 0x2c0   : > { %v1131_v4 = vsel %vm475_vm1, %v1069_v59, 0.0  ;;  %v1435_v49 = vsel %vm980_vm6, 1.0, %v1646_v46 }
 0x2c1   : > { %1132 = vadd.xlane.f32.xlu1 %v1131_v4  ;;  %v1076_v34 = vmul.f32 %v1435_v49, %v2020_v1  ;;  %v1158_v1 = vsel %vm475_vm1, %v1078_v54, 0.0  ;;  %v1173_v43 = vsel %vm475_vm1, %v1083_v42, 0.0  ;;  %v1118_v4 = vpop.xlane.xlu1 %1117  ;;  %v2853_v42 = vld [vmem:[#allocation40_spill] sm:$0xff] }
 0x2c3   : > { %v918_v14 = vpop.permute.xlu0 %917  ;;  %v1152_v16 = vsel %vm475_vm1, %v1076_v34, 0.0 }
 0x2c4   : > { %vm976_vm2 = vcmp.eq.s32.totalorder %v2317_v31, %v918_v14  ;;  %v2838_v14 = vld [vmem:[#allocation60_spill] sm:$0xff] }
 0x2c5   : > { %v1431_v56 = vsel %vm976_vm2, 1.0, %v1646_v46 }
 0x2c6   : > { %v1072_v10 = vmul.f32 %v1431_v56, %v1964_v41  ;;  %v939_v8 = vpop.permute.xlu2 %938  ;;  %v1557_v56 = vpop.eup %1556 }
 0x2c7   : > { %vm983_vm8 = vcmp.eq.s32.totalorder %v2317_v31, %v939_v8 }
 0x2c8   : > { %v1140_v17 = vsel %vm475_vm1, %v1072_v10, 0.0  ;;  %v1438_v25 = vsel %vm983_vm8, 1.0, %v1646_v46 }
 0x2c9   : > { %1138 = vadd.xlane.f32.xlu1 %v1137_v12  ;;  %1141 = vadd.xlane.f32.xlu2 %v1140_v17  ;;  %v1079_v61 = vmul.f32 %v1438_v25, %v2044_v13  ;;  %v1167_v13 = vsel %vm475_vm1, %v1081_v5, 0.0  ;;  %v1121_v32 = vpop.xlane.xlu1 %1120  ;;  %v785_v12 = vmul.f32 0.6931472, %v1557_v56  ;;  %v2840_v17 = vld [vmem:[#allocation65_spill] sm:$0xff]  ;;  %v2860_v56 = vld [vmem:[#allocation12_spill] sm:$0xff] }
 0x2ca   : > { %vm2861_vm3 = vcmp.lt.s32.totalorder %v2860_v56, 512 }
 0x2cb   : > { %v927_v58 = vpop.permute.xlu0 %926  ;;  %v1161_v36 = vsel %vm475_vm1, %v1079_v61, 0.0 }
 0x2cc   : > { %vm979_vm5 = vcmp.eq.s32.totalorder %v2317_v31, %v927_v58 }
 0x2cd   : > { %v1434_v41 = vsel %vm979_vm5, 1.0, %v1646_v46 }
 0x2ce   : > { %v1075_v15 = vmul.f32 %v1434_v41, %v2006_v40  ;;  %v954_v50 = vpop.permute.xlu2 %953  ;;  %v838_v41 = vadd.f32 %v785_v12, %v2842_v18 }
 0x2cf   : > { %vm988_vm2 = vcmp.eq.s32.totalorder %v2317_v31, %v954_v50 }
 0x2d0   : > { %v1149_v52 = vsel %vm475_vm1, %v1075_v15, 0.0  ;;  %v1443_v33 = vsel %vm988_vm2, 1.0, %v1646_v46 }
 0x2d1   : > { %1144 = vadd.xlane.f32.xlu1 %v1143_v2  ;;  %1147 = vadd.xlane.f32.xlu2 %v1146_v48  ;;  %v1084_v62 = vmul.f32 %v1443_v33, %v2834_v0  ;;  %v1127_v37 = vpop.xlane.xlu1 %1126  ;;  %v1192_v48 = vsub.f32 %v838_v41, %v1118_v4  ;;  %v2852_v33 = vld [vmem:[#allocation41_spill] sm:$0xff]  ;;  %v2854_v0 = vld [vmem:[#allocation68_spill] sm:$0xff] }
 0x2d2   : > { %1150 = vadd.xlane.f32.xlu0 %v1149_v52  ;;  %v2843_v52 = vld [vmem:[#allocation38_spill] sm:$0xff] }
 0x2d3   : > { %v942_v40 = vpop.permute.xlu0 %941  ;;  %v1176_v27 = vsel %vm475_vm1, %v1084_v62, 0.0  ;;  %v1224_v3 = vsel %vm357_vm13, %v1192_v48, 0.0  ;;  %vm2859_vm13 = vcmp.lt.s32.totalorder %v2858_v21, 512  ;;  %v2864_v48 = vld [vmem:[#allocation72_spill] sm:$0xff] }
 0x2d4   : > { %vm984_vm10 = vcmp.eq.s32.totalorder %v2317_v31, %v942_v40  ;;  %v2845_v40 = vld [vmem:[#allocation67_spill] sm:$0xff]  ;;  %v1267_v47 = vsel %vm1247_vm12, %v1224_v3, 0.0  ;;  %v2871_v3 = vld [vmem:[#allocation44_spill] sm:$0xff] }
 0x2d5   : > { %v1439_v45 = vsel %vm984_vm10, 1.0, %v1646_v46 }
 0x2d6   : > { %v1080_v7 = vmul.f32 %v1439_v45, %v2830_v11  ;;  %v2849_v11 = vld [vmem:[#allocation8_spill] sm:$0xff] }
 0x2d8   : > { %v1164_v30 = vsel %vm475_vm1, %v1080_v7, 0.0 }
 0x2d9   : > { %1153 = vadd.xlane.f32.xlu1 %v1152_v16  ;;  %1156 = vadd.xlane.f32.xlu2 %v1155_v51  ;;  %v2846_v51 = vld [vmem:[#allocation66_spill] sm:$0xff] }
 0x2da   : > { %1159 = vadd.xlane.f32.xlu0 %v1158_v1 }
 0x2db   : > { %v948_v38 = vpop.permute.xlu0 %947 }
 0x2dc   : > { %vm986_vm14 = vcmp.eq.s32.totalorder %v2317_v31, %v948_v38 }
 0x2dd   : > { %v1441_v60 = vsel %vm986_vm14, 1.0, %v1646_v46 }
 0x2de   : > { %v1082_v35 = vmul.f32 %v1441_v60, %v2833_v44  ;;  %v1130_v60 = vpop.xlane.xlu1 %1129 }
 0x2e0   : > { %v1170_v28 = vsel %vm475_vm1, %v1082_v35, 0.0 }
 0x2e1   : > { %1162 = vadd.xlane.f32.xlu1 %v1161_v36  ;;  %1165 = vadd.xlane.f32.xlu2 %v1164_v30 }
 0x2e2   : > { %1168 = vadd.xlane.f32.xlu0 %v1167_v13 }
 0x2e3   : > { %v957_v23 = vpop.permute.xlu0 %956 }
 0x2e4   : > { %vm989_vm4 = vcmp.eq.s32.totalorder %v2317_v31, %v957_v23  ;;  %v2837_v31 = vld [vmem:[#allocation61_spill] sm:$0xff] }
 0x2e5   : > { %v1444_v19 = vsel %vm989_vm4, 1.0, %v1646_v46  ;;  %1558 = vlog2.f32 %v2837_v31 }
 0x2e6   : > { %v1085_v29 = vmul.f32 %v1444_v19, %v2835_v20  ;;  %1560 = vlog2.f32 %v2838_v14  ;;  %v2855_v20 = vld [vmem:[#allocation69_spill] sm:$0xff] }
 0x2e7   : > { %1562 = vlog2.f32 %v2839_v53 }
 0x2e8   : > { %v1179_v59 = vsel %vm475_vm1, %v1085_v29, 0.0  ;;  %1564 = vlog2.f32 %v2840_v17  ;;  %vm2850_vm1 = vcmp.lt.s32.totalorder %v2849_v11, 512 }
 0x2e9   : > { %1174 = vadd.xlane.f32.xlu2 %v1173_v43  ;;  %1171 = vadd.xlane.f32.xlu1 %v1170_v28  ;;  %1566 = vlog2.f32 %v2841_v24 }
 0x2ea   : > { %1177 = vadd.xlane.f32.xlu0 %v1176_v27  ;;  %1568 = vlog2.f32 %v2845_v40  ;;  %v2866_v40 = vld [vmem:[#allocation70_spill] sm:$0xff] }
 0x2eb   : > { %v1559_v46 = vpop.eup %1558  ;;  %1570 = vlog2.f32 %v2846_v51 }
 0x2ec   : > { %v1561_v10 = vpop.eup %1560  ;;  %v787_v55 = vmul.f32 0.6931472, %v1559_v46  ;;  %1572 = vlog2.f32 %v2854_v0 }
 0x2ed   : > { %v783_v58 = vmul.f32 0.6931472, %v1561_v10  ;;  %v1563_v15 = vpop.eup %1562  ;;  %1574 = vlog2.f32 %v2855_v20  ;;  %v2862_v10 = vld [vmem:[#allocation45_spill] sm:$0xff]  ;;  %v2880_v20 = vld [vmem:[#allocation48_spill] sm:$0xff] }
 0x2ee   : > { %v1565_v2 = vpop.eup %1564  ;;  %v839_v49 = vadd.f32 %v787_v55, %v2843_v52  ;;  %v791_v9 = vmul.f32 0.6931472, %v1563_v15  ;;  %1576 = vlog2.f32 %v2864_v48 }
 0x2ef   : > { %v837_v8 = vadd.f32 %v783_v58, %v2844_v22  ;;  %v1567_v26 = vpop.eup %1566  ;;  %v793_v25 = vmul.f32 0.6931472, %v1565_v2 }
 0x2f0   : > { %v1193_v54 = vsub.f32 %v839_v49, %v1121_v32  ;;  %v789_v45 = vmul.f32 0.6931472, %v1567_v26  ;;  %v841_v5 = vadd.f32 %v791_v9, %v2851_v63  ;;  %v1569_v30 = vpop.eup %1568 }
 0x2f1   : > { %1180 = vadd.xlane.f32.xlu1 %v1179_v59  ;;  %v842_v23 = vadd.f32 %v793_v25, %v2852_v33  ;;  %v1571_v35 = vpop.eup %1570  ;;  %v797_v28 = vmul.f32 0.6931472, %v1569_v30  ;;  %v2856_v59 = vld [vmem:[#allocation13_spill] sm:$0xff]  ;;  %v2873_v30 = vld [vmem:[#allocation75_spill] sm:$0xff]  ;;  %v2874_v33 = vld [vmem:[#allocation74_spill] sm:$0xff] }
 0x2f2   : > { %v1225_v7 = vsel %vm2850_vm1, %v1193_v54, 0.0  ;;  %v1195_v13 = vsub.f32 %v841_v5, %v1127_v37  ;;  %v840_v44 = vadd.f32 %v789_v45, %v2853_v42  ;;  %v795_v29 = vmul.f32 0.6931472, %v1571_v35  ;;  %v1573_v17 = vpop.eup %1572  ;;  %v2863_v37 = vld [vmem:[#allocation43_spill] sm:$0xff]  ;;  %v2869_v54 = vld [vmem:[#allocation14_spill] sm:$0xff]  ;;  %v2876_v42 = vld [vmem:[#allocation16_spill] sm:$0xff] }
 0x2f3   : > { %v1269_v62 = vsel %vm1247_vm12, %v1225_v7, 0.0  ;;  %v1196_v19 = vsub.f32 %v842_v23, %v1130_v60  ;;  %v844_v53 = vadd.f32 %v797_v28, %v2862_v10  ;;  %v1575_v41 = vpop.eup %1574  ;;  %v799_v22 = vmul.f32 0.6931472, %v1573_v17  ;;  %v2878_v35 = vld [vmem:[#allocation18_spill] sm:$0xff] }
 0x2f4   : > { %v843_v18 = vadd.f32 %v795_v29, %v2863_v37  ;;  %v801_v26 = vmul.f32 0.6931472, %v1575_v41  ;;  %vm2870_vm6 = vcmp.lt.s32.totalorder %v2869_v54, 512  ;;  %v1577_v1 = vpop.eup %1576  ;;  %vm2877_vm7 = vcmp.lt.s32.totalorder %v2876_v42, 512  ;;  %v2883_v10 = vld [vmem:[#allocation78_spill] sm:$0xff]  ;;  %v2892_v54 = vld [vmem:[#allocation51_spill] sm:$0xff] }
 0x2f5   : > { %v1228_v46 = vsel %vm2861_vm3, %v1196_v19, 0.0  ;;  %v845_v38 = vadd.f32 %v799_v22, %v2871_v3  ;;  %vm2879_vm15 = vcmp.lt.s32.totalorder %v2878_v35, 512  ;;  %v2886_v41 = vld [vmem:[#allocation22_spill] sm:$0xff] }
 0x2f6   : > { %v1275_v15 = vsel %vm1247_vm12, %v1228_v46, 0.0  ;;  %vm2887_vm8 = vcmp.lt.s32.totalorder %v2886_v41, 512  ;;  %v2907_v41 = vld [vmem:[#allocation19_spill] sm:$0xff] }
 0x2f7   : > { %vm2908_vm4 = vcmp.lt.s32.totalorder %v2907_v41, 512 }
 0x324   : > { %v1115_v34 = vpop.xlane.xlu2 %1114 }
 0x325   : > { %v1191_v16 = vsub.f32 %v837_v8, %v1115_v34  ;;  %v2865_v8 = vld [vmem:[#allocation71_spill] sm:$0xff]  ;;  %v2867_v34 = vld [vmem:[#allocation17_spill] sm:$0xff] }
 0x326   : > { %1578 = vlog2.f32 %v2865_v8  ;;  %vm2868_vm5 = vcmp.lt.s32.totalorder %v2867_v34, 512  ;;  %v2890_v8 = vld [vmem:[#allocation24_spill] sm:$0xff] }
 0x327   : > { %v1223_v50 = vsel %vm356_vm11, %v1191_v16, 0.0  ;;  %vm2857_vm11 = vcmp.lt.s32.totalorder %v2856_v59, 512  ;;  %1580 = vlog2.f32 %v2866_v40  ;;  %v2881_v59 = vld [vmem:[#allocation47_spill] sm:$0xff]  ;;  %vm2891_vm9 = vcmp.lt.s32.totalorder %v2890_v8, 512 }
 0x328   : > { %v1265_v61 = vsel %vm1247_vm12, %v1223_v50, 0.0  ;;  %v1227_v4 = vsel %vm2857_vm11, %v1195_v13, 0.0  ;;  %1582 = vlog2.f32 %v2873_v30  ;;  %v805_v13 = vmul.f32 0.6931472, %v1577_v1  ;;  %v2911_v8 = vld [vmem:[#allocation23_spill] sm:$0xff] }
 0x329   : > { %v1266_v36 = vadd.f32 %v1265_v61, %v2463_v57  ;;  %v1273_v24 = vsel %vm1247_vm12, %v1227_v4, 0.0  ;;  %v2872_v61 = vld [vmem:[#allocation46_spill] sm:$0xff]  ;;  %1584 = vlog2.f32 %v2874_v33  ;;  %vm2912_vm11 = vcmp.lt.s32.totalorder %v2911_v8, 512 }
 0x32a   : > { %v846_v11 = vadd.f32 %v801_v26, %v2872_v61  ;;  %v848_v4 = vadd.f32 %v805_v13, %v2881_v59 }
 0x32b   : > { %v1268_v6 = vadd.f32 %v1267_v47, %v1266_v36 }
 0x32c   : > { %v1124_v43 = vpop.xlane.xlu0 %1123  ;;  %v1136_v14 = vpop.xlane.xlu2 %1135 }
 0x32d   : > { %v1270_v27 = vadd.f32 %v1269_v62, %v1268_v6  ;;  %v1194_v57 = vsub.f32 %v840_v44, %v1124_v43  ;;  %v1198_v55 = vsub.f32 %v844_v53, %v1136_v14  ;;  %v1579_v7 = vpop.eup %1578  ;;  %v2875_v6 = vld [vmem:[#allocation73_spill] sm:$0xff] }
 0x32e   : > { %v1581_v36 = vpop.eup %1580  ;;  %v803_v23 = vmul.f32 0.6931472, %v1579_v7  ;;  %1586 = vlog2.f32 %v2875_v6  ;;  %v2895_v7 = vld [vmem:[#allocation81_spill] sm:$0xff]  ;;  %v2898_v6 = vld [vmem:[#allocation28_spill] sm:$0xff] }
 0x32f   : > { %v1226_v31 = vsel %vm2859_vm13, %v1194_v57, 0.0  ;;  %v1230_v9 = vsel %vm2868_vm5, %v1198_v55, 0.0  ;;  %v807_v62 = vmul.f32 0.6931472, %v1581_v36  ;;  %1588 = vlog2.f32 %v2883_v10  ;;  %v2884_v55 = vld [vmem:[#allocation77_spill] sm:$0xff] }
 0x330   : > { %v1271_v32 = vsel %vm1247_vm12, %v1226_v31, 0.0  ;;  %v1279_v45 = vsel %vm1247_vm12, %v1230_v9, 0.0  ;;  %v847_v29 = vadd.f32 %v803_v23, %v2880_v20  ;;  %1590 = vlog2.f32 %v2884_v55  ;;  %v2897_v23 = vld [vmem:[#allocation79_spill] sm:$0xff] }
 0x331   : > { %v1272_v12 = vadd.f32 %v1271_v32, %v1270_v27  ;;  %v1583_v27 = vpop.eup %1582  ;;  %v2882_v32 = vld [vmem:[#allocation49_spill] sm:$0xff]  ;;  %vm2899_vm0 = vcmp.lt.s32.totalorder %v2898_v6, 512 }
 0x332   : > { %v1585_v21 = vpop.eup %1584  ;;  %v849_v56 = vadd.f32 %v807_v62, %v2882_v32 }
 0x333   : > { %v1274_v58 = vadd.f32 %v1273_v24, %v1272_v12  ;;  %v811_v24 = vmul.f32 0.6931472, %v1583_v27  ;;  %v809_v37 = vmul.f32 0.6931472, %v1585_v21 }
 0x334   : > { %v1133_v2 = vpop.xlane.xlu1 %1132  ;;  %v1587_v46 = vpop.eup %1586 }
 0x335   : > { %v1197_v52 = vsub.f32 %v843_v18, %v1133_v2  ;;  %v1276_v49 = vadd.f32 %v1275_v15, %v1274_v58  ;;  %v2885_v18 = vld [vmem:[#allocation76_spill] sm:$0xff]  ;;  %v1589_v34 = vpop.eup %1588 }
 0x336   : > { %1592 = vlog2.f32 %v2885_v18  ;;  %v2888_v2 = vld [vmem:[#allocation20_spill] sm:$0xff] }
 0x337   : > { %v1229_v16 = vsel %vm2870_vm6, %v1197_v52, 0.0  ;;  %vm2889_vm10 = vcmp.lt.s32.totalorder %v2888_v2, 512  ;;  %v813_v52 = vmul.f32 0.6931472, %v1587_v46  ;;  %1594 = vlog2.f32 %v2895_v7  ;;  %v2906_v46 = vld [vmem:[#allocation55_spill] sm:$0xff] }
 0x338   : > { %v1277_v51 = vsel %vm1247_vm12, %v1229_v16, 0.0  ;;  %v850_v16 = vadd.f32 %v809_v37, %v2892_v54  ;;  %v2909_v2 = vld [vmem:[#allocation15_spill] sm:$0xff]  ;;  %v2914_v54 = vld [vmem:[#allocation57_spill] sm:$0xff] }
 0x339   : > { %v1278_v25 = vadd.f32 %v1277_v51, %v1276_v49  ;;  %v2893_v51 = vld [vmem:[#allocation50_spill] sm:$0xff]  ;;  %vm2910_vm1 = vcmp.lt.s32.totalorder %v2909_v2, 512 }
 0x33b   : > { %v1280_v50 = vadd.f32 %v1279_v45, %v1278_v25  ;;  %v851_v25 = vadd.f32 %v811_v24, %v2893_v51  ;;  %v1591_v45 = vpop.eup %1590 }
 0x33c   : > { %v1139_v63 = vpop.xlane.xlu1 %1138  ;;  %v1142_v5 = vpop.xlane.xlu2 %1141  ;;  %v815_v33 = vmul.f32 0.6931472, %v1591_v45 }
 0x33d   : > { %v1199_v47 = vsub.f32 %v845_v38, %v1139_v63  ;;  %v1200_v60 = vsub.f32 %v846_v11, %v1142_v5  ;;  %v1593_v11 = vpop.eup %1592 }
 0x33f   : > { %v1231_v44 = vsel %vm2877_vm7, %v1199_v47, 0.0  ;;  %v1232_v0 = vsel %vm2879_vm15, %v1200_v60, 0.0  ;;  %v817_v47 = vmul.f32 0.6931472, %v1589_v34  ;;  %v2896_v60 = vld [vmem:[#allocation80_spill] sm:$0xff]  ;;  %vm1322_vm7 = vcmask 0  }
 0x340   : > { %v1281_v43 = vsel %vm1247_vm12, %v1231_v44, 0.0  ;;  %v1283_v19 = vsel %vm1247_vm12, %v1232_v0, 0.0  ;;  %1596 = vlog2.f32 %v2896_v60  ;;  %v2900_v44 = vld [vmem:[#allocation27_spill] sm:$0xff]  ;;  %v819_v0 = vmul.f32 0.6931472, %v1593_v11 }
 0x341   : > { %v1282_v28 = vadd.f32 %v1281_v43, %v1280_v50  ;;  %v2894_v50 = vld [vmem:[#allocation52_spill] sm:$0xff]  ;;  %1598 = vlog2.f32 %v2897_v23  ;;  %vm2901_vm14 = vcmp.lt.s32.totalorder %v2900_v44, 512  ;;  %v2920_v23 = vld [vmem:[#allocation26_spill] sm:$0xff]  ;;  %v2922_v44 = vld [vmem:[#allocation59_spill] sm:$0xff] }
 0x342   : > { %v852_v61 = vadd.f32 %v813_v52, %v2894_v50  ;;  %v855_v10 = vadd.f32 %v819_v0, %v2906_v46  ;;  %1600 = vlog2.f32 %v2327_v39  ;;  %v2913_v39 = vld [vmem:[#allocation56_spill] sm:$0xff]  ;;  %vm2921_vm5 = vcmp.lt.s32.totalorder %v2920_v23, 512  ;;  %v1246_v46 = vld [vmem:[#allocation4] sm:$0x1] }
 0x343   : > { %v1284_v57 = vadd.f32 %v1283_v19, %v1282_v28  ;;  %v2902_v28 = vld [vmem:[#allocation30_spill] sm:$0xff] }
 0x344   : > { %v1145_v31 = vpop.xlane.xlu1 %1144  ;;  %v1148_v14 = vpop.xlane.xlu2 %1147  ;;  %vm2903_vm2 = vcmp.lt.s32.totalorder %v2902_v28, 512 }
 0x345   : > { %v1201_v53 = vsub.f32 %v847_v29, %v1145_v31  ;;  %v1202_v12 = vsub.f32 %v848_v4, %v1148_v14  ;;  %v1151_v17 = vpop.xlane.xlu0 %1150  ;;  %v2904_v29 = vld [vmem:[#allocation54_spill] sm:$0xff]  ;;  %v2905_v4 = vld [vmem:[#allocation53_spill] sm:$0xff] }
 0x346   : > { %v1203_v58 = vsub.f32 %v849_v56, %v1151_v17  ;;  %v853_v59 = vadd.f32 %v815_v33, %v2904_v29  ;;  %v854_v21 = vadd.f32 %v817_v47, %v2905_v4  ;;  %v2918_v47 = vld [vmem:[#allocation25_spill] sm:$0xff] }
 0x347   : > { %v1233_v15 = vsel %vm2887_vm8, %v1201_v53, 0.0  ;;  %v1234_v48 = vsel %vm2889_vm10, %v1202_v12, 0.0  ;;  %vm2919_vm3 = vcmp.lt.s32.totalorder %v2918_v47, 512 }
 0x348   : > { %v1285_v49 = vsel %vm1247_vm12, %v1233_v15, 0.0  ;;  %v1235_v26 = vsel %vm2891_vm9, %v1203_v58, 0.0  ;;  %v1287_v40 = vsel %vm1247_vm12, %v1234_v48, 0.0 }
 0x349   : > { %v1286_v22 = vadd.f32 %v1285_v49, %v1284_v57  ;;  %v1289_v1 = vsel %vm1247_vm12, %v1235_v26, 0.0  ;;  %v1595_v57 = vpop.eup %1594 }
 0x34a   : > { %v1597_v31 = vpop.eup %1596  ;;  %v823_v37 = vmul.f32 0.6931472, %v1595_v57 }
 0x34b   : > { %v1288_v9 = vadd.f32 %v1287_v40, %v1286_v22  ;;  %v1599_v53 = vpop.eup %1598  ;;  %v821_v18 = vmul.f32 0.6931472, %v1597_v31 }
 0x34c   : > { %v1154_v3 = vpop.xlane.xlu1 %1153  ;;  %v1157_v38 = vpop.xlane.xlu2 %1156  ;;  %v825_v52 = vmul.f32 0.6931472, %v1599_v53 }
 0x34d   : > { %v1290_v63 = vadd.f32 %v1289_v1, %v1288_v9  ;;  %v1204_v5 = vsub.f32 %v850_v16, %v1154_v3  ;;  %v1205_v36 = vsub.f32 %v851_v25, %v1157_v38  ;;  %v1160_v30 = vpop.xlane.xlu0 %1159  ;;  %v857_v9 = vadd.f32 %v823_v37, %v2913_v39  ;;  %v1601_v51 = vpop.eup %1600  ;;  %v2915_v3 = vld [vmem:[#allocation58_spill] sm:$0xff] }
 0x34e   : > { %v1206_v13 = vsub.f32 %v852_v61, %v1160_v30  ;;  %v856_v16 = vadd.f32 %v821_v18, %v2914_v54  ;;  %v858_v38 = vadd.f32 %v825_v52, %v2915_v3 }
 0x34f   : > { %v1236_v42 = vsel %vm2899_vm0, %v1204_v5, 0.0  ;;  %v1237_v35 = vsel %vm2901_vm14, %v1205_v36, 0.0  ;;  %v827_v5 = vmul.f32 0.6931472, %v1601_v51  ;;  %v2916_v36 = vld [vmem:[#allocation21_spill] sm:$0xff] }
 0x350   : > { %v1291_v62 = vsel %vm1247_vm12, %v1236_v42, 0.0  ;;  %v1238_v19 = vsel %vm2903_vm2, %v1206_v13, 0.0  ;;  %v1293_v27 = vsel %vm1247_vm12, %v1237_v35, 0.0  ;;  %vm2917_vm13 = vcmp.lt.s32.totalorder %v2916_v36, 512 }
 0x351   : > { %v1292_v43 = vadd.f32 %v1291_v62, %v1290_v63  ;;  %v1295_v14 = vsel %vm1247_vm12, %v1238_v19, 0.0  ;;  %v859_v35 = vadd.f32 %v827_v5, %v2922_v44 }
 0x353   : > { %v1294_v20 = vadd.f32 %v1293_v27, %v1292_v43  ;;  %v2923_v27 = vld [vmem:[#allocation29_spill] sm:$0xff] }
 0x354   : > { %v1163_v32 = vpop.xlane.xlu1 %1162  ;;  %v1166_v56 = vpop.xlane.xlu2 %1165  ;;  %vm2924_vm6 = vcmp.lt.s32.totalorder %v2923_v27, 512 }
 0x355   : > { %v1296_v12 = vadd.f32 %v1295_v14, %v1294_v20  ;;  %v1207_v17 = vsub.f32 %v853_v59, %v1163_v32  ;;  %v1208_v24 = vsub.f32 %v854_v21, %v1166_v56  ;;  %v1169_v55 = vpop.xlane.xlu0 %1168 }
 0x356   : > { %v1209_v58 = vsub.f32 %v855_v10, %v1169_v55 }
 0x357   : > { %v1239_v15 = vsel %vm2908_vm4, %v1207_v17, 0.0  ;;  %v1240_v48 = vsel %vm2910_vm1, %v1208_v24, 0.0 }
 0x358   : > { %v1297_v49 = vsel %vm1247_vm12, %v1239_v15, 0.0  ;;  %v1241_v26 = vsel %vm2912_vm11, %v1209_v58, 0.0  ;;  %v1299_v40 = vsel %vm1247_vm12, %v1240_v48, 0.0 }
 0x359   : > { %v1298_v22 = vadd.f32 %v1297_v49, %v1296_v12  ;;  %v1301_v25 = vsel %vm1247_vm12, %v1241_v26, 0.0 }
 0x35b   : > { %v1300_v34 = vadd.f32 %v1299_v40, %v1298_v22 }
 0x35c   : > { %v1175_v45 = vpop.xlane.xlu2 %1174  ;;  %v1172_v1 = vpop.xlane.xlu1 %1171 }
 0x35d   : > { %v1302_v50 = vadd.f32 %v1301_v25, %v1300_v34  ;;  %v1211_v61 = vsub.f32 %v857_v9, %v1175_v45  ;;  %v1210_v11 = vsub.f32 %v856_v16, %v1172_v1  ;;  %v1178_v7 = vpop.xlane.xlu0 %1177 }
 0x35e   : > { %v1212_v63 = vsub.f32 %v858_v38, %v1178_v7 }
 0x35f   : > { %v1243_v30 = vsel %vm2917_vm13, %v1211_v61, 0.0  ;;  %v1242_v60 = vsel %vm2919_vm3, %v1210_v11, 0.0 }
 0x360   : > { %v1303_v13 = vsel %vm1247_vm12, %v1242_v60, 0.0  ;;  %v1244_v6 = vsel %vm2921_vm5, %v1212_v63, 0.0  ;;  %v1305_v42 = vsel %vm1247_vm12, %v1243_v30, 0.0 }
 0x361   : > { %v1304_v33 = vadd.f32 %v1303_v13, %v1302_v50  ;;  %v1307_v62 = vsel %vm1247_vm12, %v1244_v6, 0.0 }
 0x363   : > { %v1306_v0 = vadd.f32 %v1305_v42, %v1304_v33 }
 0x364   : > { %v1181_v43 = vpop.xlane.xlu1 %1180 }
 0x365   : > { %v1213_v28 = vsub.f32 %v859_v35, %v1181_v43  ;;  %v1308_v19 = vadd.f32 %v1307_v62, %v1306_v0 }
 0x367   : > { %v1245_v57 = vsel %vm2924_vm6, %v1213_v28, 0.0 }
 0x368   : > { %v1309_v20 = vsel %vm1247_vm12, %v1245_v57, 0.0 }
 0x369   : > { %v1310_v29 = vadd.f32 %v1309_v20, %v1308_v19 }
 0x36b   : > { %1311 = vadd.xlane.f32.xlu2 %v1310_v29 }
 0x3de   : > { %v1312_v59 = vpop.xlane.xlu2 %1311 }
 0x3df   : > { %v1313_v4 = vrot.slane %v1312_v59, 4 }
 0x3e1   : > { %v1314_v21 = vadd.f32 %v1313_v4, %v1312_v59 }
 0x3e3   : > { %v1315_v31 = vrot.slane %v1314_v21, 2 }
 0x3e5   : > { %v1316_v14 = vadd.f32 %v1315_v31, %v1314_v21 }
 0x3e7   : > { %v1317_v32 = vrot.slane %v1316_v14, 1 }
 0x3e9   : > { %v1318_v56 = vadd.f32 %v1317_v32, %v1316_v14 }
 0x3eb   : > { %1450 = vpush %v1318_v56 }
 0x41c   : > { %s1451_s28 = spop %1450  ;;  %1327 = sbr.rel (%p1445_p5) target bundleno = 1079 (0x437), region = 44 }
 0x41d   : > { %v1320_v10 = vstv %s1451_s28 }
 0x41e   : > { %v1321_v53 = vadd.f32 %v1320_v10, %v1246_v46 }
 0x420   : > { %1323 = vst.msk [vmem:[#allocation4] sm:$0x1] %vm1322_vm7, %v1321_v53 }
 0x421   : > { %v1647_v12 = vmov 512.0   ;;  %v1340_v15 = vstv %s1339_s5 }
 0x422   : > { %1602 = vrcp.f32 %v1647_v12 }
 0x427   : > { %v1328_v37 = vld [vmem:[#allocation4] sm:$0x1] }
 0x428   : > { %v1603_v17 = vpop.eup %1602 }
 0x429   : > { %v1330_v24 = vmul.f32 512.0, %v1603_v17  ;;  %vm1334_vm12 = vweird.f32 %v1603_v17 }
 0x42b   : > { %v1331_v55 = vsub.f32 1.0, %v1330_v24 }
 0x42d   : > { %v1332_v58 = vmul.f32 %v1603_v17, %v1331_v55 }
 0x42f   : > { %v1333_v18 = vadd.f32 %v1603_v17, %v1332_v58 }
 0x431   : > { %v1335_v41 = vsel %vm1334_vm12, %v1603_v17, %v1333_v18 }
 0x432   : > { %v1336_v2 = vmul.f32 %v1335_v41, %v1328_v37 }
 0x434   : > { %v1341_v48 = vadd.f32 %v1340_v15, %v1336_v2 }
 0x436   : > { %1342 = vst.msk [vmem:[#allocation4] sm:$0x1] %vm1322_vm7, %v1341_v48 }
 0x437 PF: > { %p1456_p6 = scmp.eq.s32.totalorder %s1686_s20, 1  ;;  %s1648_s6 = smov [#allocation4]  }
 0x438   : > { %s1349_s7 = sshll.u32 %s1648_s6, 4  ;;  %s1351_s10 = sshll.u32 %s2677_s4, 4  ;;  %s1350_s7 = int_to_ptr.vmem [resolvable:$true] %s1349_s7  ;;  %s1352_s10 = int_to_ptr.hbm [resolvable:$true] %s1351_s10 }
 0x439   : > { %1453 = dma.vmem_to_hbm [thread:$0]  (%p1456_p6), %s1350_s7, 16, %s1352_s10, [#allocation5]  }
 0x43a   : > { %1637 = dma.done.wait (%p1456_p6), [#allocation5], 16  }
 0x43b   : > { %1639 = vsyncadd (%p1456_p6), [#allocation5], 4294967280 }
 0x43c PF: > { %s17_s19 = sadd.s32 1, %s1642_s19  }
 0x43d   : > { %p14_p7 = scmp.ge.s32.totalorder %s17_s19, 4  }
 0x43f   :  { %16 = sbr.rel (!%p14_p7) target bundleno = 4 (0x4), region = 74 }
 0x444   :  { %1365 = vsyncpa [#allocation5], 1 }
 0x445   :  { %1367 = vsyncpa [#allocation5 + $0x1], 1 }

</bundles_post_ra>
